<compile_context>
chip_gen: v7x
topology: tpu7x:2x2x1
jax: 0.10.0
libtpu: 0.0.40
codegen_flags: <defaults>
</compile_context>

<pallas_src>
import numpy as np
import jax
import jax.numpy as jnp
from jax import lax
from jax.experimental import pallas as pl
from jax.experimental.pallas import tpu as pltpu


def _self_attn_kernel(x_ref, xt_ref, wqt_ref, bq_ref, wk_ref, bk_ref,
                      wv_ref, bv_ref, gamma_ref, o_ref):
    # x_ref   : (C, N)  one batch element, channels x flattened spatial
    # xt_ref  : (N, C)  same data, pre-transposed (for the query projection)
    # wqt_ref : (C, Ck) query weight, transposed ; bq_ref : (1, Ck)
    # wk_ref  : (Ck, C)                          ; bk_ref : (Ck, 1)
    # wv_ref  : (C, C)                           ; bv_ref : (C, 1)
    # gamma_ref: (1,) SMEM scalar
    # o_ref   : (C, N)
    x = x_ref[...]                                                       # (C, N)
    xt = xt_ref[...]                                                     # (N, C)

    # 1x1 convolutions == channel matmuls (MXU, f32 accumulate).
    q_t = jnp.dot(xt, wqt_ref[...],
                  preferred_element_type=jnp.float32) + bq_ref[...]      # (N, Ck)
    k = jnp.dot(wk_ref[...], x,
                preferred_element_type=jnp.float32) + bk_ref[...]        # (Ck, N)
    v = jnp.dot(wv_ref[...], x,
                preferred_element_type=jnp.float32) + bv_ref[...]        # (C, N)

    # energy[i, j] = <q[:, i], k[:, j]>
    energy = jnp.dot(q_t, k, preferred_element_type=jnp.float32)         # (N, N)

    # Row-wise softmax (dim=-1), numerically stabilized.
    m = jnp.max(energy, axis=-1, keepdims=True)
    p = jnp.exp(energy - m)
    s = jnp.sum(p, axis=-1, keepdims=True)
    attn = p / s                                                         # (N, N)

    # out[c, i] = sum_j v[c, j] * attn[i, j]   ==  v @ attn^T  (rhs-transposed dot)
    out = lax.dot_general(v, attn,
                          dimension_numbers=(((1,), (1,)), ((), ())),
                          preferred_element_type=jnp.float32)            # (C, N)

    o_ref[...] = (gamma_ref[0] * out + x.astype(jnp.float32)).astype(o_ref.dtype)


def self_attn_forward(x, wq, bq, wk, bk, wv, bv, gamma):
    """JAX/Pallas forward of Self_Attn. x: (B, C, W, H), NCHW like PyTorch."""
    B, C, W, H = x.shape
    N = W * H
    Ck = wq.shape[0]

    x_flat = x.reshape(B, C, N)
    x_t = jnp.transpose(x_flat, (0, 2, 1))                 # (B, N, C)

    wq_t = jnp.asarray(wq, jnp.float32).T                  # (C, Ck)
    bq_r = jnp.asarray(bq, jnp.float32).reshape(1, Ck)     # broadcast over N rows
    wk_f = jnp.asarray(wk, jnp.float32)                    # (Ck, C)
    bk_c = jnp.asarray(bk, jnp.float32).reshape(Ck, 1)
    wv_f = jnp.asarray(wv, jnp.float32)                    # (C, C)
    bv_c = jnp.asarray(bv, jnp.float32).reshape(C, 1)
    gamma_s = jnp.asarray(gamma, jnp.float32).reshape(1,)

    itemsize = jnp.dtype(x.dtype).itemsize
    flops = 2 * B * (2 * N * C * Ck + N * C * C + N * N * Ck + N * N * C)
    bytes_accessed = 2 * B * C * N * itemsize * 2 + (2 * Ck * C + C * C) * 4

    out_flat = pl.pallas_call(
        _self_attn_kernel,
        out_shape=jax.ShapeDtypeStruct((B, C, N), x.dtype),
        grid_spec=pltpu.PrefetchScalarGridSpec(
            num_scalar_prefetch=0,
            grid=(B,),
            in_specs=[
                pl.BlockSpec((None, C, N), lambda b: (b, 0, 0)),    # x   (C, N)
                pl.BlockSpec((None, N, C), lambda b: (b, 0, 0)),    # x^T (N, C)
                pl.BlockSpec((C, Ck), lambda b: (0, 0)),            # Wq^T
                pl.BlockSpec((1, Ck), lambda b: (0, 0)),            # bq
                pl.BlockSpec((Ck, C), lambda b: (0, 0)),            # Wk
                pl.BlockSpec((Ck, 1), lambda b: (0, 0)),            # bk
                pl.BlockSpec((C, C), lambda b: (0, 0)),             # Wv
                pl.BlockSpec((C, 1), lambda b: (0, 0)),             # bv
                pl.BlockSpec(memory_space=pltpu.MemorySpace.SMEM),  # gamma scalar
            ],
            out_specs=pl.BlockSpec((None, C, N), lambda b: (b, 0, 0)),
        ),
        compiler_params=pltpu.CompilerParams(
            dimension_semantics=("parallel",),
        ),
        cost_estimate=pl.CostEstimate(
            flops=flops,
            transcendentals=B * N * N,
            bytes_accessed=bytes_accessed,
        ),
    )(x_flat, x_t, wq_t, bq_r, wk_f, bk_c, wv_f, bv_c, gamma_s)

    return out_flat.reshape(B, C, W, H)


class SelfAttn:
    """JAX/Pallas equivalent of the PyTorch Self_Attn module."""

    def __init__(self, wq, bq, wk, bk, wv, bv, gamma):
        self.wq, self.bq = wq, bq
        self.wk, self.bk = wk, bk
        self.wv, self.bv = wv, bv
        self.gamma = gamma

    def __call__(self, x, label=None):
        return self_attn_forward(x, self.wq, self.bq, self.wk, self.bk,
                                 self.wv, self.bv, self.gamma)


def _reference_self_attn(x, wq, bq, wk, bk, wv, bv, gamma):
    """Pure JAX reference mirroring the PyTorch forward, for verification."""
    B, C, W, H = x.shape
    N = W * H
    hp = jax.lax.Precision.HIGHEST
    xf = x.reshape(B, C, N).astype(jnp.float32)
    q = jnp.einsum('oc,bcn->bon', wq, xf, precision=hp) + bq[None, :, None]
    k = jnp.einsum('oc,bcn->bon', wk, xf, precision=hp) + bk[None, :, None]
    v = jnp.einsum('oc,bcn->bon', wv, xf, precision=hp) + bv[None, :, None]
    energy = jnp.einsum('bci,bcj->bij', q, k, precision=hp)       # (B, N, N)
    attn = jax.nn.softmax(energy, axis=-1)
    out = jnp.einsum('bcj,bij->bci', v, attn, precision=hp)       # (B, C, N)
    out = gamma * out + xf
    return out.reshape(B, C, W, H).astype(x.dtype)


if __name__ == "__main__":
    key = jax.random.PRNGKey(0)
    B, C, W, H = 2, 32, 16, 16      # in_dim = 32 -> C/8 = 4, N = 256
    Ck = C // 8

    ks = jax.random.split(key, 7)
    x = jax.random.normal(ks[0], (B, C, W, H), dtype=jnp.float32)
    scale = 1.0 / np.sqrt(C)
    wq = jax.random.normal(ks[1], (Ck, C), jnp.float32) * scale
    bq = jax.random.normal(ks[2], (Ck,), jnp.float32) * 0.1
    wk = jax.random.normal(ks[3], (Ck, C), jnp.float32) * scale
    bk = jax.random.normal(ks[4], (Ck,), jnp.float32) * 0.1
    wv = jax.random.normal(ks[5], (C, C), jnp.float32) * scale
    bv = jax.random.normal(ks[6], (C,), jnp.float32) * 0.1
    # PyTorch initializes gamma to 0 (which would trivially return x);
    # use a nonzero gamma so the attention path is actually exercised.
    gamma = jnp.float32(0.7)

    module = SelfAttn(wq, bq, wk, bk, wv, bv, gamma)
    out = module(x)
    out = jax.block_until_ready(out)

    ref = _reference_self_attn(x, wq, bq, wk, bk, wv, bv, gamma)
    assert out.shape == x.shape, out.shape
    assert out.dtype == x.dtype, out.dtype
    np.testing.assert_allclose(np.asarray(out), np.asarray(ref),
                               rtol=2e-3, atol=2e-3)

    print("KERNEL_OK")
</pallas_src>

<mosaic_0001>
module attributes {stable_mosaic.version = 11 : i64} {
  func.func @_self_attn_kernel(%arg0: i32, %arg1: memref<1x32x256xf32, #tpu.memory_space<vmem>>, %arg2: memref<1x256x32xf32, #tpu.memory_space<vmem>>, %arg3: memref<32x4xf32, #tpu.memory_space<vmem>>, %arg4: memref<1x4xf32, #tpu.memory_space<vmem>>, %arg5: memref<4x32xf32, #tpu.memory_space<vmem>>, %arg6: memref<4x1xf32, #tpu.memory_space<vmem>>, %arg7: memref<32x32xf32, #tpu.memory_space<vmem>>, %arg8: memref<32x1xf32, #tpu.memory_space<vmem>>, %arg9: memref<1xf32, #tpu.memory_space<smem>>, %arg10: memref<1x32x256xf32, #tpu.memory_space<vmem>>) attributes {dimension_semantics = [#tpu.dimension_semantics<parallel>], iteration_bounds = array<i64: 2>, scalar_prefetch = 0 : i64, scratch_operands = 0 : i64, tpu.core_type = #tpu.core_type<tc>, window_params = [{transform_indices = @transform_0, window_bounds = array<i64: 1, 32, 256>}, {transform_indices = @transform_1, window_bounds = array<i64: 1, 256, 32>}, {pipeline_mode = #tpu.pipeline_mode<synchronous>, transform_indices = @transform_2, window_bounds = array<i64: 32, 4>}, {pipeline_mode = #tpu.pipeline_mode<synchronous>, transform_indices = @transform_3, window_bounds = array<i64: 1, 4>}, {pipeline_mode = #tpu.pipeline_mode<synchronous>, transform_indices = @transform_4, window_bounds = array<i64: 4, 32>}, {pipeline_mode = #tpu.pipeline_mode<synchronous>, transform_indices = @transform_5, window_bounds = array<i64: 4, 1>}, {pipeline_mode = #tpu.pipeline_mode<synchronous>, transform_indices = @transform_6, window_bounds = array<i64: 32, 32>}, {pipeline_mode = #tpu.pipeline_mode<synchronous>, transform_indices = @transform_7, window_bounds = array<i64: 32, 1>}, {transform_indices = @transform_8, window_bounds = array<i64: 1>}, {transform_indices = @transform_9, window_bounds = array<i64: 1, 32, 256>}]} {
    %c0 = arith.constant 0 : index
    %c0_0 = arith.constant 0 : index
    %c0_1 = arith.constant 0 : index
    %0 = vector.load %arg1[%c0, %c0_0, %c0_1] : memref<1x32x256xf32, #tpu.memory_space<vmem>>, vector<1x32x256xf32>
    %1 = vector.shape_cast %0 : vector<1x32x256xf32> to vector<32x256xf32>
    %c0_2 = arith.constant 0 : index
    %c0_3 = arith.constant 0 : index
    %c0_4 = arith.constant 0 : index
    %2 = vector.load %arg2[%c0_2, %c0_3, %c0_4] : memref<1x256x32xf32, #tpu.memory_space<vmem>>, vector<1x256x32xf32>
    %3 = vector.shape_cast %2 : vector<1x256x32xf32> to vector<256x32xf32>
    %c0_5 = arith.constant 0 : index
    %c0_6 = arith.constant 0 : index
    %4 = vector.load %arg3[%c0_5, %c0_6] : memref<32x4xf32, #tpu.memory_space<vmem>>, vector<32x4xf32>
    %cst = arith.constant dense<0.000000e+00> : vector<256x4xf32>
    %5 = tpu.matmul %3, %4, %cst {dimension_numbers = #tpu.dot_dimension_numbers<[1], [0], [0], [1], [0, 0, 1, 1], [], []>} : vector<256x32xf32>, vector<32x4xf32>, vector<256x4xf32> -> vector<256x4xf32>
    %c0_7 = arith.constant 0 : index
    %c0_8 = arith.constant 0 : index
    %6 = vector.load %arg4[%c0_7, %c0_8] : memref<1x4xf32, #tpu.memory_space<vmem>>, vector<1x4xf32>
    %7 = vector.broadcast %6 : vector<1x4xf32> to vector<256x4xf32>
    %8 = arith.addf %5, %7 : vector<256x4xf32>
    %c0_9 = arith.constant 0 : index
    %c0_10 = arith.constant 0 : index
    %9 = vector.load %arg5[%c0_9, %c0_10] : memref<4x32xf32, #tpu.memory_space<vmem>>, vector<4x32xf32>
    %cst_11 = arith.constant dense<0.000000e+00> : vector<4x256xf32>
    %10 = tpu.matmul %9, %1, %cst_11 {dimension_numbers = #tpu.dot_dimension_numbers<[1], [0], [0], [1], [0, 0, 1, 1], [], []>} : vector<4x32xf32>, vector<32x256xf32>, vector<4x256xf32> -> vector<4x256xf32>
    %c0_12 = arith.constant 0 : index
    %c0_13 = arith.constant 0 : index
    %11 = vector.load %arg6[%c0_12, %c0_13] : memref<4x1xf32, #tpu.memory_space<vmem>>, vector<4x1xf32>
    %12 = vector.broadcast %11 : vector<4x1xf32> to vector<4x256xf32>
    %13 = arith.addf %10, %12 : vector<4x256xf32>
    %c0_14 = arith.constant 0 : index
    %c0_15 = arith.constant 0 : index
    %14 = vector.load %arg7[%c0_14, %c0_15] : memref<32x32xf32, #tpu.memory_space<vmem>>, vector<32x32xf32>
    %cst_16 = arith.constant dense<0.000000e+00> : vector<32x256xf32>
    %15 = tpu.matmul %14, %1, %cst_16 {dimension_numbers = #tpu.dot_dimension_numbers<[1], [0], [0], [1], [0, 0, 1, 1], [], []>} : vector<32x32xf32>, vector<32x256xf32>, vector<32x256xf32> -> vector<32x256xf32>
    %c0_17 = arith.constant 0 : index
    %c0_18 = arith.constant 0 : index
    %16 = vector.load %arg8[%c0_17, %c0_18] : memref<32x1xf32, #tpu.memory_space<vmem>>, vector<32x1xf32>
    %17 = vector.broadcast %16 : vector<32x1xf32> to vector<32x256xf32>
    %18 = arith.addf %15, %17 : vector<32x256xf32>
    %cst_19 = arith.constant dense<0.000000e+00> : vector<256x256xf32>
    %19 = tpu.matmul %8, %13, %cst_19 {dimension_numbers = #tpu.dot_dimension_numbers<[1], [0], [0], [1], [0, 0, 1, 1], [], []>} : vector<256x4xf32>, vector<4x256xf32>, vector<256x256xf32> -> vector<256x256xf32>
    %cst_20 = arith.constant dense<0xFF800000> : vector<256xf32>
    %20 = vector.multi_reduction <maximumf>, %19, %cst_20 [1] : vector<256x256xf32> to vector<256xf32>
    %21 = vector.shape_cast %20 : vector<256xf32> to vector<256x1xf32>
    %22 = vector.broadcast %21 : vector<256x1xf32> to vector<256x256xf32>
    %23 = arith.subf %19, %22 : vector<256x256xf32>
    %24 = math.exp %23 : vector<256x256xf32>
    %cst_21 = arith.constant dense<0.000000e+00> : vector<256xf32>
    %25 = vector.multi_reduction <add>, %24, %cst_21 [1] : vector<256x256xf32> to vector<256xf32>
    %26 = vector.shape_cast %25 : vector<256xf32> to vector<256x1xf32>
    %27 = vector.broadcast %26 : vector<256x1xf32> to vector<256x256xf32>
    %28 = arith.divf %24, %27 : vector<256x256xf32>
    %cst_22 = arith.constant dense<0.000000e+00> : vector<32x256xf32>
    %29 = tpu.matmul %18, %28, %cst_22 {dimension_numbers = #tpu.dot_dimension_numbers<[1], [1], [0], [0], [0, 0, 1, 0], [], []>} : vector<32x256xf32>, vector<256x256xf32>, vector<32x256xf32> -> vector<32x256xf32>
    %c0_23 = arith.constant 0 : index
    %30 = memref.load %arg9[%c0_23] : memref<1xf32, #tpu.memory_space<smem>>
    %31 = vector.broadcast %30 : f32 to vector<32x256xf32>
    %32 = arith.mulf %31, %29 : vector<32x256xf32>
    %33 = arith.addf %32, %1 : vector<32x256xf32>
    %c0_24 = arith.constant 0 : index
    %c0_25 = arith.constant 0 : index
    %c0_26 = arith.constant 0 : index
    %34 = vector.load %arg10[%c0_24, %c0_25, %c0_26] : memref<1x32x256xf32, #tpu.memory_space<vmem>>, vector<1x32x256xf32>
    %35 = vector.shape_cast %34 : vector<1x32x256xf32> to vector<32x256xf32>
    %36 = vector.shape_cast %33 : vector<32x256xf32> to vector<1x32x256xf32>
    tpu.vector_store %arg10[%c0_24, %c0_25, %c0_26], %36 {strides = array<i32>} : memref<1x32x256xf32, #tpu.memory_space<vmem>>, vector<1x32x256xf32>,
    return
  }
  func.func @transform_0(%arg0: i32) -> (i32, i32, i32) {
    %c0_i32 = arith.constant 0 : i32
    %c0_i32_0 = arith.constant 0 : i32
    %c0_i32_1 = arith.constant 0 : i32
    return %arg0, %c0_i32, %c0_i32_0 : i32, i32, i32
  }
  func.func @transform_1(%arg0: i32) -> (i32, i32, i32) {
    %c0_i32 = arith.constant 0 : i32
    %c0_i32_0 = arith.constant 0 : i32
    %c0_i32_1 = arith.constant 0 : i32
    return %arg0, %c0_i32, %c0_i32_0 : i32, i32, i32
  }
  func.func @transform_2(%arg0: i32) -> (i32, i32) {
    %c0_i32 = arith.constant 0 : i32
    %c0_i32_0 = arith.constant 0 : i32
    %c0_i32_1 = arith.constant 0 : i32
    return %c0_i32, %c0_i32_0 : i32, i32
  }
  func.func @transform_3(%arg0: i32) -> (i32, i32) {
    %c0_i32 = arith.constant 0 : i32
    %c0_i32_0 = arith.constant 0 : i32
    %c0_i32_1 = arith.constant 0 : i32
    return %c0_i32, %c0_i32_0 : i32, i32
  }
  func.func @transform_4(%arg0: i32) -> (i32, i32) {
    %c0_i32 = arith.constant 0 : i32
    %c0_i32_0 = arith.constant 0 : i32
    %c0_i32_1 = arith.constant 0 : i32
    return %c0_i32, %c0_i32_0 : i32, i32
  }
  func.func @transform_5(%arg0: i32) -> (i32, i32) {
    %c0_i32 = arith.constant 0 : i32
    %c0_i32_0 = arith.constant 0 : i32
    %c0_i32_1 = arith.constant 0 : i32
    return %c0_i32, %c0_i32_0 : i32, i32
  }
  func.func @transform_6(%arg0: i32) -> (i32, i32) {
    %c0_i32 = arith.constant 0 : i32
    %c0_i32_0 = arith.constant 0 : i32
    %c0_i32_1 = arith.constant 0 : i32
    return %c0_i32, %c0_i32_0 : i32, i32
  }
  func.func @transform_7(%arg0: i32) -> (i32, i32) {
    %c0_i32 = arith.constant 0 : i32
    %c0_i32_0 = arith.constant 0 : i32
    %c0_i32_1 = arith.constant 0 : i32
    return %c0_i32, %c0_i32_0 : i32, i32
  }
  func.func @transform_8(%arg0: i32) -> i32 {
    %c0_i32 = arith.constant 0 : i32
    %c0_i32_0 = arith.constant 0 : i32
    return %c0_i32 : i32
  }
  func.func @transform_9(%arg0: i32) -> (i32, i32, i32) {
    %c0_i32 = arith.constant 0 : i32
    %c0_i32_0 = arith.constant 0 : i32
    %c0_i32_1 = arith.constant 0 : i32
    return %arg0, %c0_i32, %c0_i32_0 : i32, i32, i32
  }
}

</mosaic_0001>

<bundles_post_ra>
// kernel: tpu_custom_call.1
= control target key start
LH: loop header
LB: loop body
LE: loop exit
PB: predicated region body
PF: predicated region fallthrough
CT: control target
= control target key end

     0   :  { %s3534_s0 = inlined_call_operand.vmem [shape: f32[2,32,256], index: 0, kind: input, shape index: {}]   ;;  %s3535_s1 = inlined_call_operand.vmem [shape: f32[2,256,32], index: 1, kind: input, shape index: {}]   ;;  %s3536_s2 = inlined_call_operand.vmem [shape: f32[32,4], index: 2, kind: input, shape index: {}]   ;;  %s3537_s3 = inlined_call_operand.vmem [shape: f32[1,4], index: 3, kind: input, shape index: {}]   ;;  %s3538_s4 = inlined_call_operand.vmem [shape: f32[4,32], index: 4, kind: input, shape index: {}]   ;;  %s3539_s5 = inlined_call_operand.vmem [shape: f32[4,1], index: 5, kind: input, shape index: {}]   ;;  %s3540_s6 = inlined_call_operand.vmem [shape: f32[32,32], index: 6, kind: input, shape index: {}]   ;;  %s3541_s7 = inlined_call_operand.vmem [shape: f32[32,1], index: 7, kind: input, shape index: {}]   ;;  %s3542_s8 = inlined_call_operand.<no memory space> [shape: f32[1], index: 8, kind: input, shape index: {}]   ;;  %s3543_s9 = inlined_call_operand.hbm [shape: f32[2,32,256], index: 9, kind: output, shape index: {}]  }
   0x1   :  { %14 = sst [smem:[#allocation2]] %s3542_s8 }
   0x2   :  { %15 = vsyncpa [#allocation4], 0 }
   0x3   :  { %17 = vsyncpa [#allocation4 + $0x1], 0  ;;  %s2615_s11 = smov 0   ;;  %s2617_s12 = smov 0  }
   0x4   :  { %s2619_s13 = smov 0   ;;  %s2621_s14 = smov 0  }
   0x5 LB: > { %s2636_s8 = sadd.s32 4294967295, %s2555_s14   ;;  %s1979_s15 = sadd.s32 4294967294, %s2555_s14   ;;  %s2555_s14 = sphi %s2621_s14, %s3656_s14   ;;  %s2551_s13 = sphi %s2619_s13, %s3655_s13   ;;  %s2547_s12 = sphi %s2617_s12, %s3654_s12   ;;  %s2543_s11 = sphi %s2615_s11, %s3653_s11  }
   0x6   : > { %s2640_s16 = sadd.s32 1, %s2555_s14   ;;  %s229_s17 = sadd.s32 1, %s2551_s13 }
   0x7   : > { %s226_s18 = ssub.s32 %s2555_s14, %s2640_s16  ;;  %p239_p0 = scmp.ne.s32.totalorder %s2551_s13, %s2547_s12 }
   0x8   : > { %p227_p1 = scmp.eq.s32.totalorder %s226_s18, 0  ;;  %p240_p2 = scmp.eq.s32.totalorder %s2636_s8, 1 }
   0x9   : > { %p245_p3 = scmp.ne.s32.totalorder %s2547_s12, %s2543_s11  ;;  %p246_p4 = scmp.eq.s32.totalorder %s1979_s15, 1 }
   0xa   : > { %s2651_s19 = scalar_select %p227_p1, %s2551_s13, %s229_s17  }
   0xb   : > { %p2653_p5 = por %p240_p2, %p239_p0  ;;  %p2657_p6 = por %p246_p4, %p245_p3 }
   0xc   : > { %p1982_p7 = scmp.ge.s32.totalorder %s2555_s14, 1  ;;  %p301_p8 = scmp.lt.s32.totalorder %s2555_s14, 3 }
   0xe   : > { %p302_p9 = pnand %p1982_p7, %p301_p8 }
  0x10   : > { %305 = sbr.rel (%p302_p9) target bundleno = 1270 (0x4f6), region = 56 }
  0x17   : > { %p342_p10 = scmp.lt.s32.totalorder %s2636_s8, 1  ;;  %v392_v0 = vld [vmem:[%s3536_s2] sm:$0xff]  ;;  %v393_v1 = vld [vmem:[%s3536_s2 + $0x8] sm:$0xff]  ;;  %v394_v2 = vld [vmem:[%s3536_s2 + $0x10] sm:$0xff]  ;;  %v2557_v5 = vmov 0.0   ;;  %v2558_v8 = vmov 0  }
  0x18   : > { %v2160_v3 = vpack.c.bf16 %v393_v1, %v392_v0  ;;  %v395_v4 = vld [vmem:[%s3536_s2 + $0x18] sm:$0xff]  ;;  %799 = vmatprep.mubr.f32.mxu1 %v2557_v5  ;;  %v726_v6 = vld [vmem:[%s3539_s5] sm:$0xf]  ;;  %2291 = vset.pattern.permute.xlu0 %v2558_v8  ;;  %vm403_vm0 = vcmask 261120   ;;  %v807_v34 = vld [vmem:[%s3540_s6 + $0x8] sm:$0xff]  ;;  %vm1032_vm1 = vcmask 1043456  }
  0x19   : > { %s343_s15 = scalar_select %p342_p10, %s2636_s8, 1  ;;  %v2164_v7 = vpack.c.bf16 %v395_v4, %v394_v2  ;;  %2292 = vset.pattern.permute.xlu1 %v2558_v8  ;;  %729 = vperm.xlu0 %2291, %v726_v6   ;;  %v725_v26 = vld [vmem:[%s3538_s4] sm:$0xf]  ;;  %v808_v37 = vld [vmem:[%s3540_s6 + $0x10] sm:$0xff]  ;;  %v809_v57 = vld [vmem:[%s3540_s6 + $0x18] sm:$0xff]  ;;  %vm935_vm2 = vcmask 31744  }
  0x1a   : > { %2161 = vmatprep.subr.bf16.mxu0 %v2160_v3  ;;  %v806_v31 = vld [vmem:[%s3540_s6] sm:$0xff]  ;;  %s1865_s23 = sld [smem:[#allocation2]]  ;;  %s339_s25 = sand.u32 1, %s2547_s12  }
  0x1b   : > { %s2065_s17 = sshll.u32 %s343_s15, 6  ;;  %s2066_s18 = sshll.u32 %s343_s15, 8  ;;  %2163 = vmatpush3.bf16.msra.mxu0 %v2160_v3  ;;  %v2791_v62 = vld [vmem:[%s3537_s3] ss:$0 sm:$0xff] }
  0x1c   : > { %s2684_s24 = scalar_lea.vmem %s3534_s0, %s2065_s17  ;;  %s2689_s27 = scalar_lea.vmem %s3535_s1, %s2066_s18  ;;  %2165 = vmatprep.subr.bf16.mxu0 %v2164_v7 }
  0x1d   : > { %v353_v9 = vld [vmem:[%s2684_s24 + $0x8] sm:$0xff]  ;;  %v355_v10 = vld [vmem:[%s2684_s24 + $0x18] sm:$0xff]  ;;  %v352_v11 = vld [vmem:[%s2684_s24] sm:$0xff]  ;;  %s1983_s26 = sshll.u32 %s339_s25, 6  ;;  %s2559_s18 = smov [#allocation3]  }
  0x1e   : > { %v2168_v12 = vpack.c.bf16 %v355_v10, %v353_v9  ;;  %v354_v13 = vld [vmem:[%s2684_s24 + $0x10] sm:$0xff]  ;;  %v357_v14 = vld [vmem:[%s2684_s24 + $0x28] sm:$0xff]  ;;  %v359_v15 = vld [vmem:[%s2684_s24 + $0x38] sm:$0xff]  ;;  %s3466_s28 = scalar_lea.vmem [#allocation3], %s1983_s26  ;;  %s2497_s22 = sshll.u32 %s2559_s18, 4  ;;  %s2498_s22 = int_to_ptr.vmem [resolvable:$false] %s2497_s22 }
  0x1f   : > { %v2170_v16 = vpack.c.bf16 %v354_v13, %v352_v11  ;;  %v2172_v17 = vpack.c.bf16 %v359_v15, %v357_v14  ;;  %v356_v18 = vld [vmem:[%s2684_s24 + $0x20] sm:$0xff]  ;;  %v358_v19 = vld [vmem:[%s2684_s24 + $0x30] sm:$0xff]  ;;  %2167 = vmatpush3.bf16.msra.mxu0 %v2164_v7  ;;  %v361_v21 = vld [vmem:[%s2689_s27 + $0x8] sm:$0xff]  ;;  %s1905_s29 = sshll.u32 %s3466_s28, 4  ;;  %s3486_s29 = int_to_ptr.vmem [resolvable:$true] %s1905_s29 }
  0x20   : > { %v360_v20 = vld [vmem:[%s2689_s27] sm:$0xff]  ;;  %2169 = vmatprep.subr.bf16.mxu1 %v2168_v12  ;;  %v362_v22 = vld [vmem:[%s2689_s27 + $0x10] sm:$0xff]  ;;  %v2174_v23 = vpack.c.bf16 %v358_v19, %v356_v18  ;;  %v363_v24 = vld [vmem:[%s2689_s27 + $0x18] sm:$0xff]  ;;  %s2493_s17 = scalar_lea.vmem %s3486_s29, 1024  ;;  %p2500_p0 = scmp.lt.s32.totalorder %s3486_s29, %s2498_s22 }
  0x21   : > { %2112 = vmatprep.mubr.msk.f32.mxu0 %vm403_vm0, %v360_v20  ;;  %2171 = vmatpush1.bf16.msra.mxu1 %v2170_v16  ;;  %v364_v25 = vld [vmem:[%s2689_s27 + $0x20] sm:$0xff]  ;;  %v365_v27 = vld [vmem:[%s2689_s27 + $0x28] sm:$0xff]  ;;  %v366_v28 = vld [vmem:[%s2689_s27 + $0x30] sm:$0xff]  ;;  %p2494_p11 = scmp.ne.s32.totalorder %s3486_s29, %s2493_s17 }
  0x22   : > { %2173 = vmatprep.subr.bf16.mxu1 %v2172_v17  ;;  %2113 = vmatmul.mubr.msk.f32.vlgmr.msra.gmra.mrb[0].mxu0 %vm403_vm0, %v361_v21  ;;  %v367_v29 = vld [vmem:[%s2689_s27 + $0x38] sm:$0xff]  ;;  %v368_v30 = vld [vmem:[%s2689_s27 + $0x40] sm:$0xff]  ;;  %v369_v32 = vld [vmem:[%s2689_s27 + $0x48] sm:$0xff] }
  0x23   : > { %2115 = vmatprep.mubr.msk.f32.mxu0 %vm403_vm0, %v362_v22  ;;  %v370_v33 = vld [vmem:[%s2689_s27 + $0x50] sm:$0xff]  ;;  %v371_v35 = vld [vmem:[%s2689_s27 + $0x58] sm:$0xff]  ;;  %v372_v36 = vld [vmem:[%s2689_s27 + $0x60] sm:$0xff]  ;;  %p2495_p12 = pnand %p2494_p11, %p2653_p5 }
  0x24   : > { %v373_v38 = vld [vmem:[%s2689_s27 + $0x68] sm:$0xff]  ;;  %v374_v39 = vld [vmem:[%s2689_s27 + $0x70] sm:$0xff]  ;;  %v375_v40 = vld [vmem:[%s2689_s27 + $0x78] sm:$0xff] }
  0x25   : > { %2175 = vmatpush1.bf16.msra.mxu1 %v2174_v23  ;;  %v376_v41 = vld [vmem:[%s2689_s27 + $0x80] sm:$0xff]  ;;  %v377_v42 = vld [vmem:[%s2689_s27 + $0x88] sm:$0xff]  ;;  %v378_v43 = vld [vmem:[%s2689_s27 + $0x90] sm:$0xff]  ;;  %p2496_p13 = pneg %p2495_p12 }
  0x26   : > { %2116 = vmatmul.mubr.msk.f32.gmra.mrb[2].mxu0 %vm403_vm0, %v363_v24  ;;  %2177 = vmatprep.subr.bf16.mxu1 %v2168_v12  ;;  %v379_v44 = vld [vmem:[%s2689_s27 + $0x98] sm:$0xff]  ;;  %v380_v45 = vld [vmem:[%s2689_s27 + $0xa0] sm:$0xff]  ;;  %v381_v46 = vld [vmem:[%s2689_s27 + $0xa8] sm:$0xff] }
  0x27   : > { %2118 = vmatprep.mubr.msk.f32.mxu0 %vm403_vm0, %v364_v25  ;;  %v382_v47 = vld [vmem:[%s2689_s27 + $0xb0] sm:$0xff]  ;;  %v383_v48 = vld [vmem:[%s2689_s27 + $0xb8] sm:$0xff]  ;;  %v384_v49 = vld [vmem:[%s2689_s27 + $0xc0] sm:$0xff] }
  0x28   : > { %2021 = vmatmul.mubr.msk.f32.vlgmr.msra.gmra.mrb[0].mxu1 %vm403_vm0, %v725_v26  ;;  %v385_v50 = vld [vmem:[%s2689_s27 + $0xc8] sm:$0xff]  ;;  %v386_v51 = vld [vmem:[%s2689_s27 + $0xd0] sm:$0xff]  ;;  %v387_v52 = vld [vmem:[%s2689_s27 + $0xd8] sm:$0xff] }
  0x29   : > { %2179 = vmatpush1.bf16.msra.mxu1 %v2170_v16  ;;  %910 = vmatprep.mubr.f32.mxu1 %v2557_v5  ;;  %v388_v53 = vld [vmem:[%s2689_s27 + $0xe0] sm:$0xff]  ;;  %v389_v54 = vld [vmem:[%s2689_s27 + $0xe8] sm:$0xff]  ;;  %v390_v55 = vld [vmem:[%s2689_s27 + $0xf0] sm:$0xff] }
  0x2a   : > { %2119 = vmatmul.mubr.msk.f32.gmra.mrb[4].mxu0 %vm403_vm0, %v365_v27  ;;  %2181 = vmatprep.subr.bf16.mxu1 %v2172_v17  ;;  %v391_v56 = vld [vmem:[%s2689_s27 + $0xf8] sm:$0xff]  ;;  %s2067_s27 = sshll.u32 %s2636_s8, 10  ;;  %s3493_s8 = scalar_lea.sflag [#allocation4], %s339_s25 }
  0x2b   : > { %2121 = vmatprep.mubr.msk.f32.mxu0 %vm403_vm0, %v366_v28  ;;  %s3484_s15 = scalar_lea.hbm %s3543_s9, %s2067_s27 }
  0x2d   : > { %2183 = vmatpush1.bf16.msra.mxu1 %v2174_v23 }
  0x2e   : > { %2122 = vmatmul.mubr.msk.f32.gmra.mrb[6].mxu0 %vm403_vm0, %v367_v29 }
  0x2f   : > { %2124 = vmatprep.mubr.msk.f32.mxu0 %vm403_vm0, %v368_v30 }
  0x30   : > { %2022 = vmatmul.mubr.msk.f32.vlgmr.msra.gmra.mrb[2].mxu1 %vm403_vm0, %v806_v31 }
  0x31   : > { %916 = vmatprep.mubr.f32.mxu1 %v2557_v5 }
  0x32   : > { %2125 = vmatmul.mubr.msk.f32.gmra.mrb[8].mxu0 %vm403_vm0, %v369_v32 }
  0x33   : > { %2127 = vmatprep.mubr.msk.f32.mxu0 %vm403_vm0, %v370_v33 }
  0x34   : > { %2023 = vmatmul.mubr.msk.f32.gmra.mrb[4].mxu1 %vm403_vm0, %v807_v34 }
  0x35   : > { %922 = vmatprep.mubr.f32.mxu1 %v2557_v5 }
  0x36   : > { %2128 = vmatmul.mubr.msk.f32.gmra.mrb[10].mxu0 %vm403_vm0, %v371_v35 }
  0x37   : > { %2130 = vmatprep.mubr.msk.f32.mxu0 %vm403_vm0, %v372_v36 }
  0x38   : > { %2024 = vmatmul.mubr.msk.f32.gmra.mrb[6].mxu1 %vm403_vm0, %v808_v37 }
  0x39   : > { %928 = vmatprep.mubr.f32.mxu1 %v2557_v5 }
  0x3a   : > { %2131 = vmatmul.mubr.msk.f32.gmra.mrb[12].mxu0 %vm403_vm0, %v373_v38 }
  0x3b   : > { %2133 = vmatprep.mubr.msk.f32.mxu0 %vm403_vm0, %v374_v39 }
  0x3c   : > { %2025 = vmatmul.mubr.msk.f32.gmra.mrb[8].mxu1 %vm403_vm0, %v809_v57 }
  0x3d   : > { %1103 = vmatprep.mubr.f32.mxu1 %v2557_v5 }
  0x3e   : > { %2134 = vmatmul.mubr.msk.f32.gmra.mrb[14].mxu0 %vm403_vm0, %v375_v40 }
  0x3f   : > { %2136 = vmatprep.mubr.msk.f32.mxu0 %vm403_vm0, %v376_v41 }
  0x42   : > { %2137 = vmatmul.mubr.msk.f32.gmra.mrb[16].mxu0 %vm403_vm0, %v377_v42 }
  0x43   : > { %2139 = vmatprep.mubr.msk.f32.mxu0 %vm403_vm0, %v378_v43 }
  0x46   : > { %2140 = vmatmul.mubr.msk.f32.gmra.mrb[18].mxu0 %vm403_vm0, %v379_v44 }
  0x47   : > { %2142 = vmatprep.mubr.msk.f32.mxu0 %vm403_vm0, %v380_v45 }
  0x4a   : > { %2143 = vmatmul.mubr.msk.f32.gmra.mrb[20].mxu0 %vm403_vm0, %v381_v46 }
  0x4b   : > { %2145 = vmatprep.mubr.msk.f32.mxu0 %vm403_vm0, %v382_v47 }
  0x4e   : > { %2146 = vmatmul.mubr.msk.f32.gmra.mrb[22].mxu0 %vm403_vm0, %v383_v48 }
  0x4f   : > { %2148 = vmatprep.mubr.msk.f32.mxu0 %vm403_vm0, %v384_v49 }
  0x52   : > { %2149 = vmatmul.mubr.msk.f32.gmra.mrb[24].mxu0 %vm403_vm0, %v385_v50 }
  0x53   : > { %2151 = vmatprep.mubr.msk.f32.mxu0 %vm403_vm0, %v386_v51 }
  0x56   : > { %2152 = vmatmul.mubr.msk.f32.gmra.mrb[26].mxu0 %vm403_vm0, %v387_v52 }
  0x57   : > { %2154 = vmatprep.mubr.msk.f32.mxu0 %vm403_vm0, %v388_v53 }
  0x5a   : > { %2155 = vmatmul.mubr.msk.f32.gmra.mrb[28].mxu0 %vm403_vm0, %v389_v54 }
  0x5b   : > { %2157 = vmatprep.mubr.msk.f32.mxu0 %vm403_vm0, %v390_v55 }
  0x5e   : > { %2158 = vmatmul.mubr.msk.f32.gmra.mrb[30].mxu0 %vm403_vm0, %v391_v56 }
  0x98   : > { %v730_v61 = vpop.permute.xlu0 %729 }
  0xf5   : > { %v2114_v58 = vpop.f32.mrb[0].mxu0 }
  0xf6   : > { %v566_v59 = vpop.f32.mrb[1].mxu0  ;;  %v572_v10 = vadd.f32 %v2114_v58, %v2791_v62 }
  0xf7   : > { %v567_v3 = vadd.f32 %v2791_v62, %v566_v59 }
  0xf9   : > { %v2117_v60 = vpop.f32.mrb[2].mxu0 }
  0xfa   : > { %v576_v63 = vpop.f32.mrb[3].mxu0  ;;  %v582_v20 = vadd.f32 %v2117_v60, %v2791_v62 }
  0xfb   : > { %v801_v0 = vpop.f32.mrb[0].mxu1  ;;  %v577_v13 = vadd.f32 %v2791_v62, %v576_v63 }
  0xfc   : > { %v803_v1 = vpop.f32.mrb[1].mxu1  ;;  %v802_v6 = vadd.f32 %v801_v0, %v730_v61 }
  0xfd   : > { %v804_v2 = vadd.f32 %v803_v1, %v730_v61  ;;  %v2120_v4 = vpop.f32.mrb[4].mxu0 }
  0xfe   : > { %v586_v7 = vpop.f32.mrb[5].mxu0  ;;  %v592_v26 = vadd.f32 %v2120_v4, %v2791_v62 }
  0xff   : > { %2026 = vmatprep.subr.msk.mxu1 %vm1032_vm1, %v804_v2  ;;  %v587_v23 = vadd.f32 %v2791_v62, %v586_v7 }
 0x100   : > { %2027 = vmatpush1.msk.msra.mxu1 %vm1032_vm1, %v802_v6 }
 0x101   : > { %2028 = vmatmul.mubr.msk.f32.vlgmr.msra.gmra.mrb[10].mxu1 %vm935_vm2, %v567_v3  ;;  %v2123_v8 = vpop.f32.mrb[6].mxu0 }
 0x102   : > { %1109 = vmatprep.mubr.f32.mxu1 %v2557_v5  ;;  %v596_v9 = vpop.f32.mrb[7].mxu0  ;;  %v602_v34 = vadd.f32 %v2123_v8, %v2791_v62 }
 0x103   : > { %v2797_v11 = vpop.f32.mrb[2].mxu1  ;;  %v597_v29 = vadd.f32 %v2791_v62, %v596_v9 }
 0x104   : > { %3574 = vst [vmem:[#allocation6_spill] sm:$0xff] %v2797_v11  ;;  %v2799_v12 = vpop.f32.mrb[3].mxu1 }
 0x105   : > { %3575 = vst [vmem:[#allocation7_spill] sm:$0xff] %v2799_v12  ;;  %2029 = vmatmul.mubr.msk.f32.gmra.mrb[12].mxu1 %vm935_vm2, %v572_v10  ;;  %v2126_v14 = vpop.f32.mrb[8].mxu0 }
 0x106   : > { %1115 = vmatprep.mubr.f32.mxu1 %v2557_v5  ;;  %v606_v15 = vpop.f32.mrb[9].mxu0  ;;  %v612_v44 = vadd.f32 %v2126_v14, %v2791_v62 }
 0x107   : > { %v2804_v16 = vpop.f32.mrb[4].mxu1  ;;  %v607_v39 = vadd.f32 %v2791_v62, %v606_v15 }
 0x108   : > { %3576 = vst [vmem:[#allocation8_spill] sm:$0xff] %v2804_v16  ;;  %v2806_v17 = vpop.f32.mrb[5].mxu1 }
 0x109   : > { %3577 = vst [vmem:[#allocation9_spill] sm:$0xff] %v2806_v17  ;;  %2030 = vmatmul.mubr.msk.f32.gmra.mrb[14].mxu1 %vm935_vm2, %v577_v13  ;;  %v2129_v18 = vpop.f32.mrb[10].mxu0 }
 0x10a   : > { %1121 = vmatprep.mubr.f32.mxu1 %v2557_v5  ;;  %v616_v19 = vpop.f32.mrb[11].mxu0  ;;  %v622_v54 = vadd.f32 %v2129_v18, %v2791_v62 }
 0x10b   : > { %v2811_v21 = vpop.f32.mrb[6].mxu1  ;;  %v617_v49 = vadd.f32 %v2791_v62, %v616_v19 }
 0x10c   : > { %3578 = vst [vmem:[#allocation10_spill] sm:$0xff] %v2811_v21  ;;  %v2813_v22 = vpop.f32.mrb[7].mxu1 }
 0x10d   : > { %3579 = vst [vmem:[#allocation11_spill] sm:$0xff] %v2813_v22  ;;  %2031 = vmatmul.mubr.msk.f32.gmra.mrb[16].mxu1 %vm935_vm2, %v582_v20  ;;  %v2132_v24 = vpop.f32.mrb[12].mxu0 }
 0x10e   : > { %1127 = vmatprep.mubr.f32.mxu1 %v2557_v5  ;;  %v626_v25 = vpop.f32.mrb[13].mxu0  ;;  %v632_v1 = vadd.f32 %v2132_v24, %v2791_v62 }
 0x10f   : > { %v627_v59 = vadd.f32 %v2791_v62, %v626_v25 }
 0x111   : > { %2032 = vmatmul.mubr.msk.f32.gmra.mrb[18].mxu1 %vm935_vm2, %v587_v23  ;;  %v2135_v27 = vpop.f32.mrb[14].mxu0 }
 0x112   : > { %1133 = vmatprep.mubr.f32.mxu1 %v2557_v5  ;;  %v636_v28 = vpop.f32.mrb[15].mxu0  ;;  %v642_v8 = vadd.f32 %v2135_v27, %v2791_v62 }
 0x113   : > { %v637_v7 = vadd.f32 %v2791_v62, %v636_v28 }
 0x115   : > { %2033 = vmatmul.mubr.msk.f32.gmra.mrb[20].mxu1 %vm935_vm2, %v592_v26  ;;  %v2138_v30 = vpop.f32.mrb[16].mxu0 }
 0x116   : > { %1139 = vmatprep.mubr.f32.mxu1 %v2557_v5  ;;  %v652_v31 = vadd.f32 %v2138_v30, %v2791_v62  ;;  %v646_v32 = vpop.f32.mrb[17].mxu0 }
 0x117   : > { %v647_v33 = vadd.f32 %v2791_v62, %v646_v32 }
 0x119   : > { %2034 = vmatmul.mubr.msk.f32.gmra.mrb[22].mxu1 %vm935_vm2, %v597_v29  ;;  %v2141_v35 = vpop.f32.mrb[18].mxu0 }
 0x11a   : > { %1145 = vmatprep.mubr.f32.mxu1 %v2557_v5  ;;  %v662_v36 = vadd.f32 %v2141_v35, %v2791_v62  ;;  %v656_v37 = vpop.f32.mrb[19].mxu0 }
 0x11b   : > { %v657_v38 = vadd.f32 %v2791_v62, %v656_v37 }
 0x11d   : > { %2035 = vmatmul.mubr.msk.f32.gmra.mrb[24].mxu1 %vm935_vm2, %v602_v34  ;;  %v2144_v40 = vpop.f32.mrb[20].mxu0 }
 0x11e   : > { %1151 = vmatprep.mubr.f32.mxu1 %v2557_v5  ;;  %v672_v41 = vadd.f32 %v2144_v40, %v2791_v62  ;;  %v666_v42 = vpop.f32.mrb[21].mxu0 }
 0x11f   : > { %v667_v43 = vadd.f32 %v2791_v62, %v666_v42 }
 0x121   : > { %2036 = vmatmul.mubr.msk.f32.gmra.mrb[26].mxu1 %vm935_vm2, %v607_v39  ;;  %v2147_v45 = vpop.f32.mrb[22].mxu0 }
 0x122   : > { %1157 = vmatprep.mubr.f32.mxu1 %v2557_v5  ;;  %v682_v46 = vadd.f32 %v2147_v45, %v2791_v62  ;;  %v676_v47 = vpop.f32.mrb[23].mxu0 }
 0x123   : > { %v677_v48 = vadd.f32 %v2791_v62, %v676_v47 }
 0x125   : > { %2037 = vmatmul.mubr.msk.f32.gmra.mrb[28].mxu1 %vm935_vm2, %v612_v44  ;;  %v2150_v50 = vpop.f32.mrb[24].mxu0 }
 0x126   : > { %1163 = vmatprep.mubr.f32.mxu1 %v2557_v5  ;;  %v692_v51 = vadd.f32 %v2150_v50, %v2791_v62  ;;  %v686_v52 = vpop.f32.mrb[25].mxu0 }
 0x127   : > { %v687_v53 = vadd.f32 %v2791_v62, %v686_v52 }
 0x129   : > { %2038 = vmatmul.mubr.msk.f32.gmra.mrb[30].mxu1 %vm935_vm2, %v617_v49  ;;  %v2153_v55 = vpop.f32.mrb[26].mxu0 }
 0x12a   : > { %1169 = vmatprep.mubr.f32.mxu1 %v2557_v5  ;;  %v702_v56 = vadd.f32 %v2153_v55, %v2791_v62  ;;  %v696_v57 = vpop.f32.mrb[27].mxu0 }
 0x12b   : > { %v697_v58 = vadd.f32 %v2791_v62, %v696_v57 }
 0x12d   : > { %2039 = vmatmul.mubr.msk.f32.gmra.mrb[32].mxu1 %vm935_vm2, %v622_v54  ;;  %v2156_v60 = vpop.f32.mrb[28].mxu0 }
 0x12e   : > { %1175 = vmatprep.mubr.f32.mxu1 %v2557_v5  ;;  %v712_v61 = vadd.f32 %v2156_v60, %v2791_v62  ;;  %v706_v63 = vpop.f32.mrb[29].mxu0 }
 0x12f   : > { %v707_v0 = vadd.f32 %v2791_v62, %v706_v63 }
 0x131   : > { %2040 = vmatmul.mubr.msk.f32.gmra.mrb[34].mxu1 %vm935_vm2, %v627_v59  ;;  %v2159_v2 = vpop.f32.mrb[30].mxu0 }
 0x132   : > { %1181 = vmatprep.mubr.f32.mxu1 %v2557_v5  ;;  %v722_v3 = vadd.f32 %v2159_v2, %v2791_v62  ;;  %v716_v4 = vpop.f32.mrb[31].mxu0 }
 0x133   : > { %v717_v6 = vadd.f32 %v2791_v62, %v716_v4  ;;  %v2877_v62 = vpop.f32.mrb[8].mxu1 }
 0x134   : > { %3580 = vst [vmem:[#allocation12_spill] sm:$0xff] %v2877_v62  ;;  %v2879_v9 = vpop.f32.mrb[9].mxu1 }
 0x135   : > { %2041 = vmatmul.mubr.msk.f32.gmra.mrb[36].mxu1 %vm935_vm2, %v632_v1  ;;  %3581 = vst [vmem:[#allocation13_spill] sm:$0xff] %v2879_v9 }
 0x136   : > { %1187 = vmatprep.mubr.f32.mxu1 %v2557_v5 }
 0x139   : > { %2042 = vmatmul.mubr.msk.f32.gmra.mrb[38].mxu1 %vm935_vm2, %v637_v7 }
 0x13a   : > { %1193 = vmatprep.mubr.f32.mxu1 %v2557_v5 }
 0x13d   : > { %2043 = vmatmul.mubr.msk.f32.gmra.mrb[40].mxu1 %vm935_vm2, %v642_v8 }
 0x13e   : > { %1199 = vmatprep.mubr.f32.mxu1 %v2557_v5 }
 0x141   : > { %2044 = vmatmul.mubr.msk.f32.gmra.mrb[42].mxu1 %vm935_vm2, %v647_v33 }
 0x142   : > { %1205 = vmatprep.mubr.f32.mxu1 %v2557_v5 }
 0x145   : > { %2045 = vmatmul.mubr.msk.f32.gmra.mrb[44].mxu1 %vm935_vm2, %v652_v31 }
 0x146   : > { %1211 = vmatprep.mubr.f32.mxu1 %v2557_v5 }
 0x149   : > { %2046 = vmatmul.mubr.msk.f32.gmra.mrb[46].mxu1 %vm935_vm2, %v657_v38 }
 0x14a   : > { %1217 = vmatprep.mubr.f32.mxu1 %v2557_v5 }
 0x14d   : > { %2047 = vmatmul.mubr.msk.f32.gmra.mrb[48].mxu1 %vm935_vm2, %v662_v36 }
 0x14e   : > { %1223 = vmatprep.mubr.f32.mxu1 %v2557_v5 }
 0x151   : > { %2048 = vmatmul.mubr.msk.f32.gmra.mrb[50].mxu1 %vm935_vm2, %v667_v43 }
 0x152   : > { %1229 = vmatprep.mubr.f32.mxu1 %v2557_v5 }
 0x155   : > { %2049 = vmatmul.mubr.msk.f32.gmra.mrb[52].mxu1 %vm935_vm2, %v672_v41 }
 0x156   : > { %1235 = vmatprep.mubr.f32.mxu1 %v2557_v5 }
 0x159   : > { %2050 = vmatmul.mubr.msk.f32.gmra.mrb[54].mxu1 %vm935_vm2, %v677_v48 }
 0x15a   : > { %1241 = vmatprep.mubr.f32.mxu1 %v2557_v5 }
 0x15d   : > { %2051 = vmatmul.mubr.msk.f32.gmra.mrb[56].mxu1 %vm935_vm2, %v682_v46 }
 0x15e   : > { %1247 = vmatprep.mubr.f32.mxu1 %v2557_v5 }
 0x161   : > { %2052 = vmatmul.mubr.msk.f32.gmra.mrb[58].mxu1 %vm935_vm2, %v687_v53 }
 0x162   : > { %1253 = vmatprep.mubr.f32.mxu1 %v2557_v5 }
 0x165   : > { %2053 = vmatmul.mubr.msk.f32.gmra.mrb[60].mxu1 %vm935_vm2, %v692_v51 }
 0x166   : > { %1259 = vmatprep.mubr.f32.mxu1 %v2557_v5 }
 0x169   : > { %2054 = vmatmul.mubr.msk.f32.gmra.mrb[62].mxu1 %vm935_vm2, %v697_v58 }
 0x16a   : > { %1265 = vmatprep.mubr.f32.mxu1 %v2557_v5 }
 0x16d   : > { %2055 = vmatmul.mubr.msk.f32.gmra.mrb[64].mxu1 %vm935_vm2, %v702_v56 }
 0x16e   : > { %1271 = vmatprep.mubr.f32.mxu1 %v2557_v5 }
 0x171   : > { %2056 = vmatmul.mubr.msk.f32.gmra.mrb[66].mxu1 %vm935_vm2, %v707_v0 }
 0x172   : > { %1277 = vmatprep.mubr.f32.mxu1 %v2557_v5 }
 0x175   : > { %2057 = vmatmul.mubr.msk.f32.gmra.mrb[68].mxu1 %vm935_vm2, %v712_v61 }
 0x176   : > { %1283 = vmatprep.mubr.f32.mxu1 %v2557_v5 }
 0x179   : > { %2058 = vmatmul.mubr.msk.f32.gmra.mrb[70].mxu1 %vm935_vm2, %v717_v6 }
 0x17a   : > { %1289 = vmatprep.mubr.f32.mxu1 %v2557_v5 }
 0x17d   : > { %2059 = vmatmul.mubr.msk.f32.gmra.mrb[72].mxu1 %vm935_vm2, %v722_v3 }
 0x1d4   : > { %v2904_v10 = vpop.f32.mrb[10].mxu1 }
 0x1d5   : > { %v2906_v13 = vpop.f32.mrb[11].mxu1 }
 0x1d6   : > { %v1296_v14 = vmax.f32 %v2904_v10, %v2906_v13 }
 0x1d8   : > { %1297 = vmax.xlane.f32.xlu0 %v1296_v14  ;;  %v2910_v15 = vpop.f32.mrb[12].mxu1 }
 0x1d9   : > { %v2912_v18 = vpop.f32.mrb[13].mxu1 }
 0x1da   : > { %v1299_v19 = vmax.f32 %v2910_v15, %v2912_v18 }
 0x1dc   : > { %1300 = vmax.xlane.f32.xlu1 %v1299_v19  ;;  %v2916_v20 = vpop.f32.mrb[14].mxu1 }
 0x1dd   : > { %v2918_v5 = vpop.f32.mrb[15].mxu1 }
 0x1de   : > { %v1302_v23 = vmax.f32 %v2916_v20, %v2918_v5 }
 0x1e0   : > { %1303 = vmax.xlane.f32.xlu1 %v1302_v23  ;;  %v2922_v24 = vpop.f32.mrb[16].mxu1 }
 0x1e1   : > { %v2924_v25 = vpop.f32.mrb[17].mxu1 }
 0x1e2   : > { %v1305_v26 = vmax.f32 %v2922_v24, %v2924_v25 }
 0x1e4   : > { %1306 = vmax.xlane.f32.xlu1 %v1305_v26  ;;  %v2928_v27 = vpop.f32.mrb[18].mxu1 }
 0x1e5   : > { %v2930_v28 = vpop.f32.mrb[19].mxu1 }
 0x1e6   : > { %v1308_v29 = vmax.f32 %v2928_v27, %v2930_v28 }
 0x1e8   : > { %1309 = vmax.xlane.f32.xlu1 %v1308_v29  ;;  %v2934_v30 = vpop.f32.mrb[20].mxu1 }
 0x1e9   : > { %v2936_v31 = vpop.f32.mrb[21].mxu1 }
 0x1ea   : > { %v1311_v32 = vmax.f32 %v2934_v30, %v2936_v31 }
 0x1ec   : > { %1312 = vmax.xlane.f32.xlu1 %v1311_v32  ;;  %v2940_v33 = vpop.f32.mrb[22].mxu1 }
 0x1ed   : > { %v2942_v34 = vpop.f32.mrb[23].mxu1 }
 0x1ee   : > { %v1314_v35 = vmax.f32 %v2940_v33, %v2942_v34 }
 0x1f0   : > { %1315 = vmax.xlane.f32.xlu1 %v1314_v35  ;;  %v2946_v36 = vpop.f32.mrb[24].mxu1 }
 0x1f1   : > { %v2948_v37 = vpop.f32.mrb[25].mxu1 }
 0x1f2   : > { %v1317_v38 = vmax.f32 %v2946_v36, %v2948_v37 }
 0x1f4   : > { %1318 = vmax.xlane.f32.xlu1 %v1317_v38  ;;  %v2952_v39 = vpop.f32.mrb[26].mxu1 }
 0x1f5   : > { %v2954_v40 = vpop.f32.mrb[27].mxu1 }
 0x1f6   : > { %v1320_v41 = vmax.f32 %v2952_v39, %v2954_v40 }
 0x1f8   : > { %1321 = vmax.xlane.f32.xlu1 %v1320_v41  ;;  %v2958_v42 = vpop.f32.mrb[28].mxu1 }
 0x1f9   : > { %v2960_v43 = vpop.f32.mrb[29].mxu1 }
 0x1fa   : > { %v1323_v44 = vmax.f32 %v2958_v42, %v2960_v43 }
 0x1fc   : > { %1324 = vmax.xlane.f32.xlu1 %v1323_v44  ;;  %v2964_v45 = vpop.f32.mrb[30].mxu1 }
 0x1fd   : > { %v2966_v46 = vpop.f32.mrb[31].mxu1 }
 0x1fe   : > { %v1326_v47 = vmax.f32 %v2964_v45, %v2966_v46 }
 0x200   : > { %1327 = vmax.xlane.f32.xlu0 %v1326_v47  ;;  %v2970_v48 = vpop.f32.mrb[32].mxu1 }
 0x201   : > { %v2972_v49 = vpop.f32.mrb[33].mxu1 }
 0x202   : > { %v1329_v50 = vmax.f32 %v2970_v48, %v2972_v49 }
 0x204   : > { %1330 = vmax.xlane.f32.xlu1 %v1329_v50  ;;  %v2976_v51 = vpop.f32.mrb[34].mxu1 }
 0x205   : > { %v2978_v52 = vpop.f32.mrb[35].mxu1 }
 0x206   : > { %v1332_v53 = vmax.f32 %v2976_v51, %v2978_v52 }
 0x208   : > { %1333 = vmax.xlane.f32.xlu0 %v1332_v53  ;;  %v2982_v54 = vpop.f32.mrb[36].mxu1 }
 0x209   : > { %v2984_v55 = vpop.f32.mrb[37].mxu1 }
 0x20a   : > { %v1335_v56 = vmax.f32 %v2982_v54, %v2984_v55 }
 0x20c   : > { %1336 = vmax.xlane.f32.xlu1 %v1335_v56  ;;  %v2988_v57 = vpop.f32.mrb[38].mxu1 }
 0x20d   : > { %v2990_v58 = vpop.f32.mrb[39].mxu1 }
 0x20e   : > { %v1338_v59 = vmax.f32 %v2988_v57, %v2990_v58 }
 0x210   : > { %1339 = vmax.xlane.f32.xlu0 %v1338_v59  ;;  %v2994_v60 = vpop.f32.mrb[40].mxu1 }
 0x211   : > { %v2996_v61 = vpop.f32.mrb[41].mxu1 }
 0x212   : > { %v1341_v63 = vmax.f32 %v2994_v60, %v2996_v61 }
 0x214   : > { %1342 = vmax.xlane.f32.xlu1 %v1341_v63  ;;  %v3000_v0 = vpop.f32.mrb[42].mxu1 }
 0x215   : > { %v3002_v1 = vpop.f32.mrb[43].mxu1 }
 0x216   : > { %v1344_v2 = vmax.f32 %v3000_v0, %v3002_v1 }
 0x218   : > { %1345 = vmax.xlane.f32.xlu0 %v1344_v2  ;;  %v3006_v3 = vpop.f32.mrb[44].mxu1 }
 0x219   : > { %v3008_v4 = vpop.f32.mrb[45].mxu1 }
 0x21a   : > { %v1347_v6 = vmax.f32 %v3006_v3, %v3008_v4 }
 0x21c   : > { %1348 = vmax.xlane.f32.xlu1 %v1347_v6  ;;  %v3012_v7 = vpop.f32.mrb[46].mxu1 }
 0x21d   : > { %v3014_v8 = vpop.f32.mrb[47].mxu1 }
 0x21e   : > { %3582 = vst [vmem:[#allocation14_spill] sm:$0xff] %v3014_v8  ;;  %v1350_v14 = vmax.f32 %v3012_v7, %v3014_v8 }
 0x220   : > { %1351 = vmax.xlane.f32.xlu0 %v1350_v14  ;;  %v3018_v19 = vpop.f32.mrb[48].mxu1 }
 0x221   : > { %3583 = vst [vmem:[#allocation15_spill] sm:$0xff] %v3018_v19  ;;  %v3020_v23 = vpop.f32.mrb[49].mxu1 }
 0x222   : > { %3584 = vst [vmem:[#allocation16_spill] sm:$0xff] %v3020_v23  ;;  %v1353_v26 = vmax.f32 %v3018_v19, %v3020_v23 }
 0x224   : > { %1354 = vmax.xlane.f32.xlu1 %v1353_v26  ;;  %v3024_v29 = vpop.f32.mrb[50].mxu1 }
 0x225   : > { %3585 = vst [vmem:[#allocation17_spill] sm:$0xff] %v3024_v29  ;;  %v3026_v32 = vpop.f32.mrb[51].mxu1 }
 0x226   : > { %3586 = vst [vmem:[#allocation18_spill] sm:$0xff] %v3026_v32  ;;  %v1356_v35 = vmax.f32 %v3024_v29, %v3026_v32 }
 0x228   : > { %1357 = vmax.xlane.f32.xlu0 %v1356_v35  ;;  %v3030_v38 = vpop.f32.mrb[52].mxu1 }
 0x229   : > { %3587 = vst [vmem:[#allocation19_spill] sm:$0xff] %v3030_v38  ;;  %v3032_v41 = vpop.f32.mrb[53].mxu1 }
 0x22a   : > { %3588 = vst [vmem:[#allocation20_spill] sm:$0xff] %v3032_v41  ;;  %v1359_v44 = vmax.f32 %v3030_v38, %v3032_v41 }
 0x22c   : > { %1360 = vmax.xlane.f32.xlu1 %v1359_v44  ;;  %v3036_v47 = vpop.f32.mrb[54].mxu1 }
 0x22d   : > { %3589 = vst [vmem:[#allocation21_spill] sm:$0xff] %v3036_v47  ;;  %v3038_v50 = vpop.f32.mrb[55].mxu1 }
 0x22e   : > { %3590 = vst [vmem:[#allocation22_spill] sm:$0xff] %v3038_v50  ;;  %v1362_v53 = vmax.f32 %v3036_v47, %v3038_v50 }
 0x230   : > { %1363 = vmax.xlane.f32.xlu0 %v1362_v53  ;;  %v3042_v56 = vpop.f32.mrb[56].mxu1 }
 0x231   : > { %3591 = vst [vmem:[#allocation23_spill] sm:$0xff] %v3042_v56  ;;  %v3044_v59 = vpop.f32.mrb[57].mxu1 }
 0x232   : > { %3592 = vst [vmem:[#allocation24_spill] sm:$0xff] %v3044_v59  ;;  %v1365_v63 = vmax.f32 %v3042_v56, %v3044_v59 }
 0x234   : > { %1366 = vmax.xlane.f32.xlu1 %v1365_v63  ;;  %v3048_v2 = vpop.f32.mrb[58].mxu1 }
 0x235   : > { %v3050_v6 = vpop.f32.mrb[59].mxu1 }
 0x238   : > { %v3054_v26 = vpop.f32.mrb[60].mxu1 }
 0x239   : > { %3593 = vst [vmem:[#allocation25_spill] sm:$0xff] %v3054_v26  ;;  %v3056_v35 = vpop.f32.mrb[61].mxu1 }
 0x23a   : > { %3594 = vst [vmem:[#allocation26_spill] sm:$0xff] %v3056_v35  ;;  %v1371_v44 = vmax.f32 %v3054_v26, %v3056_v35 }
 0x23c   : > { %1372 = vmax.xlane.f32.xlu1 %v1371_v44  ;;  %v3060_v53 = vpop.f32.mrb[62].mxu1 }
 0x23d   : > { %v3062_v62 = vpop.f32.mrb[63].mxu1 }
 0x240   : > { %v3066_v9 = vpop.f32.mrb[64].mxu1 }
 0x241   : > { %v3068_v21 = vpop.f32.mrb[65].mxu1 }
 0x244   : > { %v3072_v22 = vpop.f32.mrb[66].mxu1 }
 0x245   : > { %v3074_v16 = vpop.f32.mrb[67].mxu1 }
 0x248   : > { %v3078_v17 = vpop.f32.mrb[68].mxu1 }
 0x249   : > { %v3080_v11 = vpop.f32.mrb[69].mxu1 }
 0x24c   : > { %v3084_v12 = vpop.f32.mrb[70].mxu1 }
 0x24d   : > { %v3086_v35 = vpop.f32.mrb[71].mxu1 }
 0x250   : > { %v3090_v26 = vpop.f32.mrb[72].mxu1 }
 0x251   : > { %v3092_v59 = vpop.f32.mrb[73].mxu1 }
 0x265   : > { %v1298_v56 = vpop.xlane.xlu0 %1297 }
 0x266   : > { %v1392_v50 = vsub.f32 %v2904_v10, %v1298_v56  ;;  %v1393_v47 = vsub.f32 %v2906_v13, %v1298_v56 }
 0x268   : > { %v1456_v63 = vmul.f32 1.442695, %v1392_v50  ;;  %v1458_v41 = vmul.f32 1.442695, %v1393_v47 }
 0x269   : > { %v1301_v38 = vpop.xlane.xlu1 %1300 }
 0x26a   : > { %2293 = vpow2.f32 %v1456_v63  ;;  %v1394_v32 = vsub.f32 %v2910_v15, %v1301_v38  ;;  %v1395_v14 = vsub.f32 %v2912_v18, %v1301_v38 }
 0x26b   : > { %2295 = vpow2.f32 %v1458_v41 }
 0x26c   : > { %v1460_v29 = vmul.f32 1.442695, %v1394_v32  ;;  %v1462_v23 = vmul.f32 1.442695, %v1395_v14 }
 0x26d   : > { %v1304_v19 = vpop.xlane.xlu1 %1303 }
 0x26e   : > { %2297 = vpow2.f32 %v1460_v29  ;;  %v1396_v44 = vsub.f32 %v2916_v20, %v1304_v19  ;;  %v1397_v8 = vsub.f32 %v2918_v5, %v1304_v19 }
 0x26f   : > { %2299 = vpow2.f32 %v1462_v23 }
 0x270   : > { %v1464_v10 = vmul.f32 1.442695, %v1396_v44  ;;  %v1466_v13 = vmul.f32 1.442695, %v1397_v8 }
 0x271   : > { %v1307_v50 = vpop.xlane.xlu1 %1306 }
 0x272   : > { %2301 = vpow2.f32 %v1464_v10  ;;  %v1398_v47 = vsub.f32 %v2922_v24, %v1307_v50  ;;  %v1399_v15 = vsub.f32 %v2924_v25, %v1307_v50 }
 0x273   : > { %2303 = vpow2.f32 %v1466_v13  ;;  %v3595_v13 = vmax.f32 %v3048_v2, %v3050_v6 }
 0x274   : > { %v3104_v18 = vpop.eup %2293  ;;  %v1468_v32 = vmul.f32 1.442695, %v1398_v47  ;;  %v1470_v38 = vmul.f32 1.442695, %v1399_v15 }
 0x275   : > { %v3106_v41 = vpop.eup %2295  ;;  %v1310_v29 = vpop.xlane.xlu1 %1309 }
 0x276   : > { %2305 = vpow2.f32 %v1468_v32  ;;  %v1400_v20 = vsub.f32 %v2928_v27, %v1310_v29  ;;  %v1401_v5 = vsub.f32 %v2930_v28, %v1310_v29  ;;  %v1584_v8 = vadd.f32 %v3106_v41, %v3104_v18 }
 0x277   : > { %2307 = vpow2.f32 %v1470_v38 }
 0x278   : > { %v3112_v24 = vpop.eup %2297  ;;  %v1472_v25 = vmul.f32 1.442695, %v1400_v20  ;;  %v1474_v19 = vmul.f32 1.442695, %v1401_v5  ;;  %1585 = vadd.xlane.f32.xlu0 %v1584_v8  ;;  %v3596_v20 = vmax.f32 %v3066_v9, %v3068_v21 }
 0x279   : > { %v3114_v23 = vpop.eup %2299  ;;  %v1313_v56 = vpop.xlane.xlu1 %1312 }
 0x27a   : > { %2309 = vpow2.f32 %v1472_v25  ;;  %v1402_v14 = vsub.f32 %v2934_v30, %v1313_v56  ;;  %v1403_v63 = vsub.f32 %v2936_v31, %v1313_v56  ;;  %v1587_v27 = vadd.f32 %v3114_v23, %v3112_v24 }
 0x27b   : > { %2311 = vpow2.f32 %v1474_v19 }
 0x27c   : > { %v3120_v28 = vpop.eup %2301  ;;  %v1476_v44 = vmul.f32 1.442695, %v1402_v14  ;;  %v1478_v10 = vmul.f32 1.442695, %v1403_v63  ;;  %1369 = vmax.xlane.f32.xlu0 %v3595_v13  ;;  %1588 = vadd.xlane.f32.xlu1 %v1587_v27  ;;  %v3597_v63 = vmax.f32 %v3060_v53, %v3062_v62 }
 0x27d   : > { %v3125_v50 = vpop.eup %2303  ;;  %v1316_v47 = vpop.xlane.xlu1 %1315 }
 0x27e   : > { %2313 = vpow2.f32 %v1476_v44  ;;  %v1404_v30 = vsub.f32 %v2940_v33, %v1316_v47  ;;  %v1405_v31 = vsub.f32 %v2942_v34, %v1316_v47  ;;  %v1590_v15 = vadd.f32 %v3125_v50, %v3120_v28 }
 0x27f   : > { %2315 = vpow2.f32 %v1478_v10 }
 0x280   : > { %v3131_v32 = vpop.eup %2305  ;;  %v1480_v38 = vmul.f32 1.442695, %v1404_v30  ;;  %v1482_v29 = vmul.f32 1.442695, %v1405_v31  ;;  %1591 = vadd.xlane.f32.xlu0 %v1590_v15  ;;  %1378 = vmax.xlane.f32.xlu1 %v3596_v20  ;;  %v3598_v31 = vmax.f32 %v3078_v17, %v3080_v11 }
 0x281   : > { %v3136_v5 = vpop.eup %2307  ;;  %v1319_v8 = vpop.xlane.xlu1 %1318 }
 0x282   : > { %2317 = vpow2.f32 %v1480_v38  ;;  %v1406_v33 = vsub.f32 %v2946_v36, %v1319_v8  ;;  %v1407_v34 = vsub.f32 %v2948_v37, %v1319_v8  ;;  %v1593_v25 = vadd.f32 %v3136_v5, %v3131_v32 }
 0x283   : > { %2319 = vpow2.f32 %v1482_v29 }
 0x284   : > { %v3142_v19 = vpop.eup %2309  ;;  %v1484_v56 = vmul.f32 1.442695, %v1406_v33  ;;  %v1486_v14 = vmul.f32 1.442695, %v1407_v34  ;;  %1375 = vmax.xlane.f32.xlu0 %v3597_v63  ;;  %1594 = vadd.xlane.f32.xlu1 %v1593_v25  ;;  %v3599_v34 = vmax.f32 %v3072_v22, %v3074_v16 }
 0x285   : > { %v3147_v27 = vpop.eup %2311  ;;  %v1322_v44 = vpop.xlane.xlu1 %1321 }
 0x286   : > { %2321 = vpow2.f32 %v1484_v56  ;;  %v1408_v36 = vsub.f32 %v2952_v39, %v1322_v44  ;;  %v1409_v37 = vsub.f32 %v2954_v40, %v1322_v44  ;;  %v1596_v10 = vadd.f32 %v3147_v27, %v3142_v19 }
 0x287   : > { %2323 = vpow2.f32 %v1486_v14 }
 0x288   : > { %v3153_v13 = vpop.eup %2313  ;;  %v1488_v47 = vmul.f32 1.442695, %v1408_v36  ;;  %v1490_v30 = vmul.f32 1.442695, %v1409_v37  ;;  %1597 = vadd.xlane.f32.xlu0 %v1596_v10  ;;  %1384 = vmax.xlane.f32.xlu1 %v3598_v31  ;;  %v3600_v37 = vmax.f32 %v3090_v26, %v3092_v59 }
 0x289   : > { %v3158_v15 = vpop.eup %2315  ;;  %v1325_v38 = vpop.xlane.xlu1 %1324 }
 0x28a   : > { %2325 = vpow2.f32 %v1488_v47  ;;  %v1410_v39 = vsub.f32 %v2958_v42, %v1325_v38  ;;  %v1411_v40 = vsub.f32 %v2960_v43, %v1325_v38  ;;  %v1599_v29 = vadd.f32 %v3158_v15, %v3153_v13 }
 0x28b   : > { %2327 = vpow2.f32 %v1490_v30 }
 0x28c   : > { %v3164_v20 = vpop.eup %2317  ;;  %v1492_v8 = vmul.f32 1.442695, %v1410_v39  ;;  %v1494_v33 = vmul.f32 1.442695, %v1411_v40  ;;  %1381 = vmax.xlane.f32.xlu0 %v3599_v34  ;;  %1600 = vadd.xlane.f32.xlu1 %v1599_v29  ;;  %v3601_v40 = vmax.f32 %v3084_v12, %v3086_v35 }
 0x28d   : > { %v3169_v25 = vpop.eup %2319  ;;  %v1328_v56 = vpop.xlane.xlu0 %1327 }
 0x28e   : > { %2329 = vpow2.f32 %v1492_v8  ;;  %v1412_v42 = vsub.f32 %v2964_v45, %v1328_v56  ;;  %v1413_v43 = vsub.f32 %v2966_v46, %v1328_v56  ;;  %v1602_v14 = vadd.f32 %v3169_v25, %v3164_v20 }
 0x28f   : > { %2331 = vpow2.f32 %v1494_v33 }
 0x290   : > { %v3175_v63 = vpop.eup %2321  ;;  %v1496_v44 = vmul.f32 1.442695, %v1412_v42  ;;  %v1498_v36 = vmul.f32 1.442695, %v1413_v43  ;;  %1603 = vadd.xlane.f32.xlu0 %v1602_v14  ;;  %1390 = vmax.xlane.f32.xlu1 %v3600_v37 }
 0x291   : > { %v3180_v10 = vpop.eup %2323  ;;  %v1331_v47 = vpop.xlane.xlu1 %1330 }
 0x292   : > { %2333 = vpow2.f32 %v1496_v44  ;;  %v1414_v45 = vsub.f32 %v2970_v48, %v1331_v47  ;;  %v1415_v46 = vsub.f32 %v2972_v49, %v1331_v47  ;;  %v1605_v30 = vadd.f32 %v3180_v10, %v3175_v63 }
 0x293   : > { %2335 = vpow2.f32 %v1498_v36 }
 0x294   : > { %v3186_v31 = vpop.eup %2325  ;;  %v1500_v38 = vmul.f32 1.442695, %v1414_v45  ;;  %v1502_v39 = vmul.f32 1.442695, %v1415_v46  ;;  %1387 = vmax.xlane.f32.xlu0 %v3601_v40  ;;  %1606 = vadd.xlane.f32.xlu1 %v1605_v30 }
 0x295   : > { %v3191_v29 = vpop.eup %2327  ;;  %v1334_v8 = vpop.xlane.xlu0 %1333 }
 0x296   : > { %2337 = vpow2.f32 %v1500_v38  ;;  %v1416_v48 = vsub.f32 %v2976_v51, %v1334_v8  ;;  %v1417_v49 = vsub.f32 %v2978_v52, %v1334_v8  ;;  %v1608_v33 = vadd.f32 %v3191_v29, %v3186_v31 }
 0x297   : > { %2339 = vpow2.f32 %v1502_v39 }
 0x298   : > { %v3197_v34 = vpop.eup %2329  ;;  %v1504_v56 = vmul.f32 1.442695, %v1416_v48  ;;  %v1506_v42 = vmul.f32 1.442695, %v1417_v49  ;;  %1609 = vadd.xlane.f32.xlu0 %v1608_v33 }
 0x299   : > { %v3199_v43 = vpop.eup %2331  ;;  %v1337_v14 = vpop.xlane.xlu1 %1336 }
 0x29a   : > { %2341 = vpow2.f32 %v1504_v56  ;;  %v1418_v44 = vsub.f32 %v2982_v54, %v1337_v14  ;;  %v1419_v36 = vsub.f32 %v2984_v55, %v1337_v14  ;;  %v1611_v51 = vadd.f32 %v3199_v43, %v3197_v34 }
 0x29b   : > { %2343 = vpow2.f32 %v1506_v42 }
 0x29c   : > { %v3205_v52 = vpop.eup %2333  ;;  %v1508_v37 = vmul.f32 1.442695, %v1418_v44  ;;  %v1510_v47 = vmul.f32 1.442695, %v1419_v36  ;;  %1612 = vadd.xlane.f32.xlu1 %v1611_v51 }
 0x29d   : > { %v3207_v45 = vpop.eup %2335  ;;  %v1340_v46 = vpop.xlane.xlu0 %1339 }
 0x29e   : > { %2345 = vpow2.f32 %v1508_v37  ;;  %v1420_v30 = vsub.f32 %v2988_v57, %v1340_v46  ;;  %v1421_v38 = vsub.f32 %v2990_v58, %v1340_v46  ;;  %v1614_v54 = vadd.f32 %v3207_v45, %v3205_v52 }
 0x29f   : > { %2347 = vpow2.f32 %v1510_v47 }
 0x2a0   : > { %v3213_v55 = vpop.eup %2337  ;;  %v1512_v39 = vmul.f32 1.442695, %v1420_v30  ;;  %v1514_v40 = vmul.f32 1.442695, %v1421_v38  ;;  %1615 = vadd.xlane.f32.xlu0 %v1614_v54 }
 0x2a1   : > { %v3215_v8 = vpop.eup %2339  ;;  %v1343_v48 = vpop.xlane.xlu1 %1342 }
 0x2a2   : > { %2349 = vpow2.f32 %v1512_v39  ;;  %v1422_v49 = vsub.f32 %v2994_v60, %v1343_v48  ;;  %v1423_v33 = vsub.f32 %v2996_v61, %v1343_v48  ;;  %v1617_v57 = vadd.f32 %v3215_v8, %v3213_v55 }
 0x2a3   : > { %2351 = vpow2.f32 %v1514_v40 }
 0x2a4   : > { %v3221_v58 = vpop.eup %2341  ;;  %v1516_v56 = vmul.f32 1.442695, %v1422_v49  ;;  %v1518_v42 = vmul.f32 1.442695, %v1423_v33  ;;  %1618 = vadd.xlane.f32.xlu1 %v1617_v57  ;;  %v3602_v57 = vld [vmem:[#allocation14_spill] sm:$0xff] }
 0x2a5   : > { %v3223_v14 = vpop.eup %2343  ;;  %v1346_v44 = vpop.xlane.xlu0 %1345 }
 0x2a6   : > { %2353 = vpow2.f32 %v1516_v56  ;;  %v1424_v36 = vsub.f32 %v3000_v0, %v1346_v44  ;;  %v1425_v51 = vsub.f32 %v3002_v1, %v1346_v44  ;;  %v1620_v60 = vadd.f32 %v3223_v14, %v3221_v58 }
 0x2a7   : > { %2355 = vpow2.f32 %v1518_v42 }
 0x2a8   : > { %v3229_v61 = vpop.eup %2345  ;;  %v1520_v37 = vmul.f32 1.442695, %v1424_v36  ;;  %v1522_v47 = vmul.f32 1.442695, %v1425_v51  ;;  %1621 = vadd.xlane.f32.xlu0 %v1620_v60  ;;  %v3603_v60 = vld [vmem:[#allocation15_spill] sm:$0xff] }
 0x2a9   : > { %v3231_v46 = vpop.eup %2347  ;;  %v1349_v30 = vpop.xlane.xlu1 %1348 }
 0x2aa   : > { %2357 = vpow2.f32 %v1520_v37  ;;  %v1426_v38 = vsub.f32 %v3006_v3, %v1349_v30  ;;  %v1427_v54 = vsub.f32 %v3008_v4, %v1349_v30  ;;  %v1623_v0 = vadd.f32 %v3231_v46, %v3229_v61 }
 0x2ab   : > { %2359 = vpow2.f32 %v1522_v47  ;;  %v3604_v47 = vld [vmem:[#allocation16_spill] sm:$0xff] }
 0x2ac   : > { %v3237_v1 = vpop.eup %2349  ;;  %v1524_v39 = vmul.f32 1.442695, %v1426_v38  ;;  %v1526_v40 = vmul.f32 1.442695, %v1427_v54  ;;  %1624 = vadd.xlane.f32.xlu1 %v1623_v0 }
 0x2ad   : > { %v3239_v48 = vpop.eup %2351  ;;  %v1352_v49 = vpop.xlane.xlu0 %1351 }
 0x2ae   : > { %2361 = vpow2.f32 %v1524_v39  ;;  %v1428_v33 = vsub.f32 %v3012_v7, %v1352_v49  ;;  %v1429_v56 = vsub.f32 %v3602_v57, %v1352_v49  ;;  %v1626_v3 = vadd.f32 %v3239_v48, %v3237_v1  ;;  %v3607_v49 = vld [vmem:[#allocation17_spill] sm:$0xff]  ;;  %v3608_v57 = vld [vmem:[#allocation18_spill] sm:$0xff] }
 0x2af   : > { %2363 = vpow2.f32 %v1526_v40 }
 0x2b0   : > { %v3245_v4 = vpop.eup %2353  ;;  %v1528_v42 = vmul.f32 1.442695, %v1428_v33  ;;  %v1530_v44 = vmul.f32 1.442695, %v1429_v56  ;;  %1627 = vadd.xlane.f32.xlu0 %v1626_v3 }
 0x2b1   : > { %v3247_v36 = vpop.eup %2355  ;;  %v1355_v51 = vpop.xlane.xlu1 %1354 }
 0x2b2   : > { %2365 = vpow2.f32 %v1528_v42  ;;  %v1430_v37 = vsub.f32 %v3603_v60, %v1355_v51  ;;  %v1431_v30 = vsub.f32 %v3604_v47, %v1355_v51  ;;  %v1629_v7 = vadd.f32 %v3247_v36, %v3245_v4  ;;  %v3611_v47 = vld [vmem:[#allocation19_spill] sm:$0xff] }
 0x2b3   : > { %2367 = vpow2.f32 %v1530_v44 }
 0x2b4   : > { %v3253_v38 = vpop.eup %2357  ;;  %v1532_v54 = vmul.f32 1.442695, %v1430_v37  ;;  %v1534_v0 = vmul.f32 1.442695, %v1431_v30  ;;  %1630 = vadd.xlane.f32.xlu1 %v1629_v7  ;;  %v3612_v7 = vld [vmem:[#allocation20_spill] sm:$0xff] }
 0x2b5   : > { %3605 = vst [vmem:[#allocation14_spill] sm:$0xff] %v3253_v38  ;;  %v3255_v39 = vpop.eup %2359  ;;  %v1358_v40 = vpop.xlane.xlu0 %1357 }
 0x2b6   : > { %3606 = vst [vmem:[#allocation15_spill] sm:$0xff] %v3255_v39  ;;  %2369 = vpow2.f32 %v1532_v54  ;;  %v1432_v33 = vsub.f32 %v3607_v49, %v1358_v40  ;;  %v1433_v56 = vsub.f32 %v3608_v57, %v1358_v40  ;;  %v1632_v3 = vadd.f32 %v3255_v39, %v3253_v38 }
 0x2b7   : > { %2371 = vpow2.f32 %v1534_v0 }
 0x2b8   : > { %v3261_v42 = vpop.eup %2361  ;;  %v1536_v44 = vmul.f32 1.442695, %v1432_v33  ;;  %v1538_v51 = vmul.f32 1.442695, %v1433_v56  ;;  %1633 = vadd.xlane.f32.xlu0 %v1632_v3  ;;  %v3614_v3 = vld [vmem:[#allocation21_spill] sm:$0xff] }
 0x2b9   : > { %3609 = vst [vmem:[#allocation16_spill] sm:$0xff] %v3261_v42  ;;  %v3263_v60 = vpop.eup %2363  ;;  %v1361_v37 = vpop.xlane.xlu1 %1360 }
 0x2ba   : > { %3610 = vst [vmem:[#allocation17_spill] sm:$0xff] %v3263_v60  ;;  %2373 = vpow2.f32 %v1536_v44  ;;  %v1434_v30 = vsub.f32 %v3611_v47, %v1361_v37  ;;  %v1435_v54 = vsub.f32 %v3612_v7, %v1361_v37  ;;  %v1635_v40 = vadd.f32 %v3263_v60, %v3261_v42  ;;  %v3615_v44 = vld [vmem:[#allocation22_spill] sm:$0xff] }
 0x2bb   : > { %2375 = vpow2.f32 %v1538_v51 }
 0x2bc   : > { %v3269_v49 = vpop.eup %2365  ;;  %v1540_v0 = vmul.f32 1.442695, %v1434_v30  ;;  %v1542_v57 = vmul.f32 1.442695, %v1435_v54  ;;  %1636 = vadd.xlane.f32.xlu1 %v1635_v40  ;;  %v3616_v40 = vld [vmem:[#allocation23_spill] sm:$0xff] }
 0x2bd   : > { %3613 = vst [vmem:[#allocation18_spill] sm:$0xff] %v3269_v49  ;;  %v3271_v33 = vpop.eup %2367  ;;  %v1364_v56 = vpop.xlane.xlu0 %1363 }
 0x2be   : > { %2377 = vpow2.f32 %v1540_v0  ;;  %v1436_v38 = vsub.f32 %v3614_v3, %v1364_v56  ;;  %v1437_v39 = vsub.f32 %v3615_v44, %v1364_v56  ;;  %v1638_v37 = vadd.f32 %v3271_v33, %v3269_v49  ;;  %v3617_v0 = vld [vmem:[#allocation24_spill] sm:$0xff] }
 0x2bf   : > { %2379 = vpow2.f32 %v1542_v57 }
 0x2c0   : > { %v3277_v47 = vpop.eup %2369  ;;  %v1544_v51 = vmul.f32 1.442695, %v1436_v38  ;;  %v1546_v7 = vmul.f32 1.442695, %v1437_v39  ;;  %1639 = vadd.xlane.f32.xlu0 %v1638_v37 }
 0x2c1   : > { %v3279_v30 = vpop.eup %2371  ;;  %v1367_v54 = vpop.xlane.xlu1 %1366 }
 0x2c2   : > { %2381 = vpow2.f32 %v1544_v51  ;;  %v1438_v42 = vsub.f32 %v3616_v40, %v1367_v54  ;;  %v1439_v60 = vsub.f32 %v3617_v0, %v1367_v54  ;;  %v1641_v56 = vadd.f32 %v3279_v30, %v3277_v47  ;;  %v3622_v40 = vld [vmem:[#allocation25_spill] sm:$0xff]  ;;  %v3623_v0 = vld [vmem:[#allocation26_spill] sm:$0xff] }
 0x2c3   : > { %2383 = vpow2.f32 %v1546_v7 }
 0x2c4   : > { %v3285_v3 = vpop.eup %2373  ;;  %v1548_v57 = vmul.f32 1.442695, %v1438_v42  ;;  %v1550_v44 = vmul.f32 1.442695, %v1439_v60  ;;  %1642 = vadd.xlane.f32.xlu1 %v1641_v56 }
 0x2c5   : > { %3618 = vst [vmem:[#allocation19_spill] sm:$0xff] %v3285_v3  ;;  %v3287_v38 = vpop.eup %2375 }
 0x2c6   : > { %3619 = vst [vmem:[#allocation20_spill] sm:$0xff] %v3287_v38  ;;  %2385 = vpow2.f32 %v1548_v57  ;;  %v1644_v39 = vadd.f32 %v3287_v38, %v3285_v3 }
 0x2c7   : > { %2387 = vpow2.f32 %v1550_v44 }
 0x2c8   : > { %v3291_v37 = vpop.eup %2377  ;;  %1645 = vadd.xlane.f32.xlu0 %v1644_v39 }
 0x2c9   : > { %3620 = vst [vmem:[#allocation21_spill] sm:$0xff] %v3291_v37  ;;  %v3293_v51 = vpop.eup %2379  ;;  %v1373_v54 = vpop.xlane.xlu1 %1372 }
 0x2ca   : > { %3621 = vst [vmem:[#allocation22_spill] sm:$0xff] %v3293_v51  ;;  %v1442_v7 = vsub.f32 %v3622_v40, %v1373_v54  ;;  %v1443_v49 = vsub.f32 %v3623_v0, %v1373_v54  ;;  %v1647_v42 = vadd.f32 %v3293_v51, %v3291_v37 }
 0x2cc   : > { %v3299_v60 = vpop.eup %2381  ;;  %v1556_v56 = vmul.f32 1.442695, %v1442_v7  ;;  %v1558_v57 = vmul.f32 1.442695, %v1443_v49  ;;  %1648 = vadd.xlane.f32.xlu1 %v1647_v42 }
 0x2cd   : > { %3624 = vst [vmem:[#allocation23_spill] sm:$0xff] %v3299_v60  ;;  %v3301_v3 = vpop.eup %2383 }
 0x2ce   : > { %3625 = vst [vmem:[#allocation24_spill] sm:$0xff] %v3301_v3  ;;  %2389 = vpow2.f32 %v1556_v56  ;;  %v1650_v44 = vadd.f32 %v3301_v3, %v3299_v60 }
 0x2cf   : > { %2391 = vpow2.f32 %v1558_v57 }
 0x2d0   : > { %v3305_v39 = vpop.eup %2385  ;;  %1651 = vadd.xlane.f32.xlu0 %v1650_v44 }
 0x2d1   : > { %3626 = vst [vmem:[#allocation25_spill] sm:$0xff] %v3305_v39  ;;  %v3307_v40 = vpop.eup %2387 }
 0x2d2   : > { %3627 = vst [vmem:[#allocation26_spill] sm:$0xff] %v3307_v40  ;;  %v1653_v54 = vadd.f32 %v3307_v40, %v3305_v39 }
 0x2d4   : > { %1654 = vadd.xlane.f32.xlu1 %v1653_v54 }
 0x2d8   : > { %v3311_v0 = vpop.eup %2389 }
 0x2d9   : > { %3628 = vst [vmem:[#allocation27_spill] sm:$0xff] %v3311_v0  ;;  %v3313_v49 = vpop.eup %2391 }
 0x2da   : > { %3629 = vst [vmem:[#allocation28_spill] sm:$0xff] %v3313_v49  ;;  %v1659_v7 = vadd.f32 %v3313_v49, %v3311_v0 }
 0x2dc   : > { %1660 = vadd.xlane.f32.xlu1 %v1659_v7 }
 0x305   : > { %v1586_v42 = vpop.xlane.xlu0 %1585 }
 0x306   : > { %2393 = vrcp.f32 %v1586_v42 }
 0x309   : > { %v1370_v56 = vpop.xlane.xlu0 %1369  ;;  %v1589_v57 = vpop.xlane.xlu1 %1588 }
 0x30a   : > { %v1440_v44 = vsub.f32 %v3048_v2, %v1370_v56  ;;  %v1441_v60 = vsub.f32 %v3050_v6, %v1370_v56  ;;  %2395 = vrcp.f32 %v1589_v57 }
 0x30c   : > { %v1552_v3 = vmul.f32 1.442695, %v1440_v44  ;;  %v1554_v39 = vmul.f32 1.442695, %v1441_v60 }
 0x30d   : > { %v1592_v54 = vpop.xlane.xlu0 %1591  ;;  %v1379_v40 = vpop.xlane.xlu1 %1378 }
 0x30e   : > { %2397 = vpow2.f32 %v1552_v3  ;;  %v1446_v37 = vsub.f32 %v3066_v9, %v1379_v40  ;;  %v1447_v51 = vsub.f32 %v3068_v21, %v1379_v40 }
 0x30f   : > { %2399 = vpow2.f32 %v1554_v39 }
 0x310   : > { %v1564_v7 = vmul.f32 1.442695, %v1446_v37  ;;  %v1566_v0 = vmul.f32 1.442695, %v1447_v51  ;;  %2401 = vrcp.f32 %v1592_v54  ;;  %v2394_v38 = vpop.eup %2393 }
 0x311   : > { %v1376_v42 = vpop.xlane.xlu0 %1375  ;;  %v1595_v49 = vpop.xlane.xlu1 %1594  ;;  %v1682_v21 = vmul.f32 %v2394_v38, %v3106_v41  ;;  %v1681_v51 = vmul.f32 %v2394_v38, %v3104_v18 }
 0x312   : > { %2403 = vpow2.f32 %v1564_v7  ;;  %v1444_v2 = vsub.f32 %v3060_v53, %v1376_v42  ;;  %v1445_v6 = vsub.f32 %v3062_v62, %v1376_v42 }
 0x313   : > { %2405 = vpow2.f32 %v1566_v0 }
 0x314   : > { %v2396_v60 = vpop.eup %2395  ;;  %v1560_v56 = vmul.f32 1.442695, %v1444_v2  ;;  %v1562_v3 = vmul.f32 1.442695, %v1445_v6  ;;  %2407 = vrcp.f32 %v1595_v49 }
 0x315   : > { %v1598_v9 = vpop.xlane.xlu0 %1597  ;;  %v1385_v57 = vpop.xlane.xlu1 %1384  ;;  %v1685_v37 = vmul.f32 %v2396_v60, %v3114_v23  ;;  %v1684_v39 = vmul.f32 %v2396_v60, %v3112_v24 }
 0x316   : > { %2409 = vpow2.f32 %v1560_v56  ;;  %v1450_v53 = vsub.f32 %v3078_v17, %v1385_v57  ;;  %v1451_v62 = vsub.f32 %v3080_v11, %v1385_v57 }
 0x317   : > { %2411 = vpow2.f32 %v1562_v3  ;;  %v2184_v40 = vpack.c.bf16 %v1685_v37, %v1682_v21  ;;  %v2186_v0 = vpack.c.bf16 %v1684_v39, %v1681_v51 }
 0x318   : > { %v3329_v44 = vpop.eup %2397  ;;  %v1572_v49 = vmul.f32 1.442695, %v1450_v53  ;;  %v1574_v54 = vmul.f32 1.442695, %v1451_v62  ;;  %2413 = vrcp.f32 %v1598_v9 }
 0x319   : > { %v3331_v7 = vpop.eup %2399  ;;  %2185 = vmatprep.subr.bf16.mxu0 %v2184_v40  ;;  %v1382_v41 = vpop.xlane.xlu0 %1381 }
 0x31a   : > { %v1601_v18 = vpop.xlane.xlu1 %1600  ;;  %2415 = vpow2.f32 %v1572_v49  ;;  %v1448_v24 = vsub.f32 %v3072_v22, %v1382_v41  ;;  %v1449_v17 = vsub.f32 %v3074_v16, %v1382_v41  ;;  %2187 = vmatpush1.bf16.xpose.msra.mxu0 %v2186_v0  ;;  %v1656_v11 = vadd.f32 %v3331_v7, %v3329_v44  ;;  %v2402_v23 = vpop.eup %2401 }
 0x31b   : > { %2417 = vpow2.f32 %v1574_v54  ;;  %v1688_v3 = vmul.f32 %v2402_v23, %v3125_v50  ;;  %v1687_v57 = vmul.f32 %v2402_v23, %v3120_v28 }
 0x31c   : > { %v3337_v38 = vpop.eup %2403  ;;  %v1568_v42 = vmul.f32 1.442695, %v1448_v24  ;;  %v1570_v2 = vmul.f32 1.442695, %v1449_v17  ;;  %2419 = vrcp.f32 %v1601_v18  ;;  %1657 = vadd.xlane.f32.xlu0 %v1656_v11 }
 0x31d   : > { %v3339_v6 = vpop.eup %2405  ;;  %v1604_v60 = vpop.xlane.xlu0 %1603 }
 0x31e   : > { %v3341_v56 = vpop.xlane.xlu1 %1390  ;;  %v2408_v22 = vpop.eup %2407  ;;  %2421 = vpow2.f32 %v1568_v42  ;;  %v1665_v16 = vadd.f32 %v3339_v6, %v3337_v38 }
 0x31f   : > { %2423 = vpow2.f32 %v1570_v2  ;;  %v1691_v9 = vmul.f32 %v2408_v22, %v3136_v5  ;;  %v1690_v21 = vmul.f32 %v2408_v22, %v3131_v32 }
 0x320   : > { %v3349_v37 = vpop.eup %2409  ;;  %1666 = vadd.xlane.f32.xlu1 %v1665_v16  ;;  %2425 = vrcp.f32 %v1604_v60 }
 0x321   : > { %v3351_v51 = vpop.eup %2411  ;;  %v2188_v39 = vpack.c.bf16 %v1691_v9, %v1688_v3  ;;  %v1388_v53 = vpop.xlane.xlu0 %1387  ;;  %v2190_v40 = vpack.c.bf16 %v1690_v21, %v1687_v57 }
 0x322   : > { %v1607_v62 = vpop.xlane.xlu1 %1606  ;;  %v1452_v0 = vsub.f32 %v3084_v12, %v1388_v53  ;;  %v1453_v50 = vsub.f32 %v3086_v35, %v1388_v53  ;;  %v1662_v5 = vadd.f32 %v3351_v51, %v3349_v37  ;;  %v2414_v28 = vpop.eup %2413 }
 0x323   : > { %2189 = vmatprep.subr.bf16.mxu0 %v2188_v39  ;;  %2427 = vrcp.f32 %v1607_v62  ;;  %v1694_v35 = vmul.f32 %v2414_v28, %v3147_v27  ;;  %v1693_v11 = vmul.f32 %v2414_v28, %v3142_v19 }
 0x324   : > { %v3357_v32 = vpop.eup %2415  ;;  %v1576_v49 = vmul.f32 1.442695, %v1452_v0  ;;  %v1578_v54 = vmul.f32 1.442695, %v1453_v50  ;;  %2191 = vmatpush1.bf16.xpose.msra.mxu0 %v2190_v40  ;;  %1663 = vadd.xlane.f32.xlu0 %v1662_v5 }
 0x325   : > { %v3359_v41 = vpop.eup %2417  ;;  %v1610_v18 = vpop.xlane.xlu0 %1609 }
 0x326   : > { %v2420_v24 = vpop.eup %2419  ;;  %2429 = vpow2.f32 %v1576_v49  ;;  %v1671_v12 = vadd.f32 %v3359_v41, %v3357_v32  ;;  %v811_v49 = vld [vmem:[%s3541_s7 + $0x8] sm:$0xff] }
 0x327   : > { %2431 = vpow2.f32 %v1578_v54  ;;  %v1697_v17 = vmul.f32 %v2420_v24, %v3158_v15  ;;  %v1696_v23 = vmul.f32 %v2420_v24, %v3153_v13 }
 0x328   : > { %v3367_v42 = vpop.eup %2421  ;;  %2433 = vrcp.f32 %v1610_v18  ;;  %1672 = vadd.xlane.f32.xlu1 %v1671_v12 }
 0x329   : > { %v3369_v2 = vpop.eup %2423  ;;  %v2192_v60 = vpack.c.bf16 %v1697_v17, %v1694_v35  ;;  %v1613_v22 = vpop.xlane.xlu1 %1612  ;;  %v2194_v16 = vpack.c.bf16 %v1696_v23, %v1693_v11 }
 0x32a   : > { %2435 = vrcp.f32 %v1613_v22  ;;  %v1668_v27 = vadd.f32 %v3369_v2, %v3367_v42  ;;  %v2426_v3 = vpop.eup %2425 }
 0x32b   : > { %2193 = vmatprep.subr.bf16.mxu0 %v2192_v60  ;;  %v1700_v13 = vmul.f32 %v2426_v3, %v3169_v25  ;;  %v1699_v57 = vmul.f32 %v2426_v3, %v3164_v20  ;;  %v1454_v3 = vsub.f32 %v3090_v26, %v3341_v56 }
 0x32c   : > { %2195 = vmatpush1.bf16.xpose.msra.mxu0 %v2194_v16  ;;  %1669 = vadd.xlane.f32.xlu0 %v1668_v27 }
 0x32d   : > { %v1616_v19 = vpop.xlane.xlu0 %1615  ;;  %v2428_v15 = vpop.eup %2427  ;;  %v1580_v26 = vmul.f32 1.442695, %v1454_v3 }
 0x32e   : > { %v1703_v9 = vmul.f32 %v2428_v15, %v3180_v10  ;;  %v1702_v21 = vmul.f32 %v2428_v15, %v3175_v63  ;;  %2437 = vrcp.f32 %v1616_v19 }
 0x330   : > { %v3377_v39 = vpop.eup %2429  ;;  %v2196_v62 = vpack.c.bf16 %v1703_v9, %v1700_v13  ;;  %v2198_v0 = vpack.c.bf16 %v1702_v21, %v1699_v57  ;;  %v810_v13 = vld [vmem:[%s3541_s7] sm:$0xff] }
 0x331   : > { %v3379_v53 = vpop.eup %2431  ;;  %v1619_v40 = vpop.xlane.xlu1 %1618 }
 0x332   : > { %v2434_v50 = vpop.eup %2433  ;;  %2439 = vrcp.f32 %v1619_v40  ;;  %v1674_v5 = vadd.f32 %v3379_v53, %v3377_v39  ;;  %2197 = vmatprep.subr.bf16.mxu0 %v2196_v62 }
 0x333   : > { %v1706_v63 = vmul.f32 %v2434_v50, %v3191_v29  ;;  %v1705_v54 = vmul.f32 %v2434_v50, %v3186_v31 }
 0x334   : > { %v2436_v25 = vpop.eup %2435  ;;  %2199 = vmatpush1.bf16.xpose.msra.mxu0 %v2198_v0  ;;  %1675 = vadd.xlane.f32.xlu0 %v1674_v5 }
 0x335   : > { %v1622_v20 = vpop.xlane.xlu0 %1621  ;;  %v1709_v10 = vmul.f32 %v2436_v25, %v3199_v43  ;;  %v1708_v28 = vmul.f32 %v2436_v25, %v3197_v34 }
 0x336   : > { %2441 = vrcp.f32 %v1622_v20 }
 0x337   : > { %v2200_v18 = vpack.c.bf16 %v1709_v10, %v1706_v63  ;;  %v2202_v24 = vpack.c.bf16 %v1708_v28, %v1705_v54  ;;  %v3630_v28 = vld [vmem:[#allocation15_spill] sm:$0xff]  ;;  %v3632_v54 = vld [vmem:[#allocation16_spill] sm:$0xff] }
 0x338   : > { %v2438_v35 = vpop.eup %2437 }
 0x339   : > { %821 = vperm.xlu1 %2292, %v811_v49   ;;  %2201 = vmatprep.subr.bf16.mxu0 %v2200_v18  ;;  %v1625_v12 = vpop.xlane.xlu1 %1624  ;;  %v1712_v43 = vmul.f32 %v2438_v35, %v3207_v45  ;;  %v1711_v23 = vmul.f32 %v2438_v35, %v3205_v52  ;;  %v1455_v52 = vsub.f32 %v3092_v59, %v3341_v56  ;;  %v813_v59 = vld [vmem:[%s3541_s7 + $0x18] sm:$0xff]  ;;  %v3633_v18 = vld [vmem:[#allocation14_spill] sm:$0xff] }
 0x33a   : > { %2443 = vrcp.f32 %v1625_v12  ;;  %v3631_v49 = vld [vmem:[#allocation17_spill] sm:$0xff] }
 0x33b   : > { %v1582_v62 = vmul.f32 1.442695, %v1455_v52  ;;  %v3635_v52 = vld [vmem:[#allocation20_spill] sm:$0xff] }
 0x33c   : > { %v2440_v17 = vpop.eup %2439  ;;  %2203 = vmatpush1.bf16.xpose.msra.mxu0 %v2202_v24 }
 0x33d   : > { %v1628_v29 = vpop.xlane.xlu0 %1627  ;;  %v1715_v34 = vmul.f32 %v2440_v17, %v3215_v8  ;;  %v1714_v11 = vmul.f32 %v2440_v17, %v3213_v55 }
 0x33e   : > { %2445 = vrcp.f32 %v1628_v29 }
 0x33f   : > { %v2204_v31 = vpack.c.bf16 %v1715_v34, %v1712_v43  ;;  %v2206_v60 = vpack.c.bf16 %v1714_v11, %v1711_v23 }
 0x340   : > { %v2442_v16 = vpop.eup %2441 }
 0x341   : > { %2205 = vmatprep.subr.bf16.mxu0 %v2204_v31  ;;  %v1631_v22 = vpop.xlane.xlu1 %1630  ;;  %v1718_v45 = vmul.f32 %v2442_v16, %v3223_v14  ;;  %v1717_v15 = vmul.f32 %v2442_v16, %v3221_v58  ;;  %v3634_v16 = vld [vmem:[#allocation18_spill] sm:$0xff] }
 0x342   : > { %2447 = vrcp.f32 %v1631_v22 }
 0x344   : > { %v2444_v27 = vpop.eup %2443  ;;  %2207 = vmatpush1.bf16.xpose.msra.mxu0 %v2206_v60 }
 0x345   : > { %v1634_v19 = vpop.xlane.xlu0 %1633  ;;  %v1721_v8 = vmul.f32 %v2444_v27, %v3231_v46  ;;  %v1720_v55 = vmul.f32 %v2444_v27, %v3229_v61 }
 0x346   : > { %2449 = vrcp.f32 %v1634_v19 }
 0x347   : > { %v2208_v9 = vpack.c.bf16 %v1721_v8, %v1718_v45  ;;  %v2210_v57 = vpack.c.bf16 %v1720_v55, %v1717_v15 }
 0x348   : > { %v2446_v14 = vpop.eup %2445 }
 0x349   : > { %2209 = vmatprep.subr.bf16.mxu0 %v2208_v9  ;;  %v1637_v21 = vpop.xlane.xlu1 %1636  ;;  %v1724_v46 = vmul.f32 %v2446_v14, %v3239_v48  ;;  %v1723_v0 = vmul.f32 %v2446_v14, %v3237_v1 }
 0x34a   : > { %816 = vperm.xlu0 %2291, %v810_v13   ;;  %2451 = vrcp.f32 %v1637_v21  ;;  %v3636_v13 = vld [vmem:[#allocation22_spill] sm:$0xff] }
 0x34b   : > { %2453 = vpow2.f32 %v1580_v26 }
 0x34c   : > { %v2448_v61 = vpop.eup %2447  ;;  %2211 = vmatpush1.bf16.xpose.msra.mxu0 %v2210_v57  ;;  %2455 = vpow2.f32 %v1582_v62  ;;  %v812_v62 = vld [vmem:[%s3541_s7 + $0x10] sm:$0xff] }
 0x34d   : > { %v1640_v58 = vpop.xlane.xlu0 %1639  ;;  %v1727_v56 = vmul.f32 %v2448_v61, %v3247_v36  ;;  %v1726_v40 = vmul.f32 %v2448_v61, %v3245_v4  ;;  %v3639_v61 = vld [vmem:[#allocation24_spill] sm:$0xff] }
 0x34e   : > { %831 = vperm.xlu0 %2291, %v813_v59   ;;  %2457 = vrcp.f32 %v1640_v58 }
 0x34f   : > { %v2212_v50 = vpack.c.bf16 %v1727_v56, %v1724_v46  ;;  %v2214_v5 = vpack.c.bf16 %v1726_v40, %v1723_v0  ;;  %v3640_v46 = vld [vmem:[#allocation26_spill] sm:$0xff]  ;;  %v3641_v40 = vld [vmem:[#allocation25_spill] sm:$0xff] }
 0x350   : > { %v2450_v20 = vpop.eup %2449 }
 0x351   : > { %2213 = vmatprep.subr.bf16.mxu0 %v2212_v50  ;;  %v1643_v25 = vpop.xlane.xlu1 %1642  ;;  %v1730_v48 = vmul.f32 %v2450_v20, %v3630_v28  ;;  %v1729_v24 = vmul.f32 %v2450_v20, %v3633_v18  ;;  %v3642_v50 = vld [vmem:[#allocation23_spill] sm:$0xff]  ;;  %v3643_v18 = vld [vmem:[#allocation28_spill] sm:$0xff] }
 0x352   : > { %2459 = vrcp.f32 %v1643_v25 }
 0x354   : > { %v2452_v63 = vpop.eup %2451  ;;  %2215 = vmatpush1.bf16.xpose.msra.mxu0 %v2214_v5 }
 0x355   : > { %v1646_v10 = vpop.xlane.xlu0 %1645  ;;  %v1733_v36 = vmul.f32 %v2452_v63, %v3631_v49  ;;  %v1732_v4 = vmul.f32 %v2452_v63, %v3632_v54  ;;  %v3416_v12 = vpop.eup %2453 }
 0x356   : > { %v3418_v35 = vpop.eup %2455  ;;  %2461 = vrcp.f32 %v1646_v10 }
 0x357   : > { %v2216_v1 = vpack.c.bf16 %v1733_v36, %v1730_v48  ;;  %v2218_v17 = vpack.c.bf16 %v1732_v4, %v1729_v24  ;;  %v1677_v34 = vadd.f32 %v3418_v35, %v3416_v12 }
 0x358   : > { %v2458_v43 = vpop.eup %2457 }
 0x359   : > { %2217 = vmatprep.subr.bf16.mxu0 %v2216_v1  ;;  %v1649_v29 = vpop.xlane.xlu1 %1648  ;;  %v1736_v31 = vmul.f32 %v2458_v43, %v3271_v33  ;;  %v1735_v27 = vmul.f32 %v2458_v43, %v3634_v16  ;;  %v3637_v33 = vld [vmem:[#allocation21_spill] sm:$0xff] }
 0x35a   : > { %2463 = vrcp.f32 %v1649_v29 }
 0x35c   : > { %v2460_v11 = vpop.eup %2459  ;;  %2219 = vmatpush1.bf16.xpose.msra.mxu0 %v2218_v17  ;;  %v3644_v17 = vld [vmem:[#allocation27_spill] sm:$0xff] }
 0x35d   : > { %1678 = vadd.xlane.f32.xlu1 %v1677_v34  ;;  %v1652_v23 = vpop.xlane.xlu0 %1651  ;;  %v1739_v60 = vmul.f32 %v2460_v11, %v3279_v30  ;;  %v1738_v22 = vmul.f32 %v2460_v11, %v3277_v47  ;;  %v3638_v30 = vld [vmem:[#allocation19_spill] sm:$0xff] }
 0x35e   : > { %2465 = vrcp.f32 %v1652_v23 }
 0x35f   : > { %v2220_v3 = vpack.c.bf16 %v1739_v60, %v1736_v31  ;;  %v2222_v19 = vpack.c.bf16 %v1738_v22, %v1735_v27 }
 0x360   : > { %v2462_v8 = vpop.eup %2461 }
 0x361   : > { %2221 = vmatprep.subr.bf16.mxu0 %v2220_v3  ;;  %v1655_v45 = vpop.xlane.xlu1 %1654  ;;  %v1742_v15 = vmul.f32 %v2462_v8, %v3635_v52  ;;  %v1741_v26 = vmul.f32 %v2462_v8, %v3638_v30 }
 0x362   : > { %2467 = vrcp.f32 %v1655_v45 }
 0x364   : > { %v2464_v55 = vpop.eup %2463  ;;  %2223 = vmatpush1.bf16.xpose.msra.mxu0 %v2222_v19 }
 0x365   : > { %v1745_v9 = vmul.f32 %v2464_v55, %v3636_v13  ;;  %v1744_v57 = vmul.f32 %v2464_v55, %v3637_v33 }
 0x367   : > { %v2224_v47 = vpack.c.bf16 %v1745_v9, %v1742_v15  ;;  %v2226_v21 = vpack.c.bf16 %v1744_v57, %v1741_v26 }
 0x368   : > { %v2466_v14 = vpop.eup %2465 }
 0x369   : > { %2225 = vmatprep.subr.bf16.mxu0 %v2224_v47  ;;  %v1748_v58 = vmul.f32 %v2466_v14, %v3639_v61  ;;  %v1747_v5 = vmul.f32 %v2466_v14, %v3642_v50  ;;  %v1661_v63 = vpop.xlane.xlu1 %1660  ;;  %v3652_v50 = vld [vmem:[#allocation12_spill] sm:$0xff] }
 0x36a   : > { %2469 = vrcp.f32 %v1661_v63 }
 0x36c   : > { %v2468_v59 = vpop.eup %2467  ;;  %2227 = vmatpush1.bf16.xpose.msra.mxu0 %v2226_v21  ;;  %v3646_v21 = vld [vmem:[#allocation6_spill] sm:$0xff] }
 0x36d   : > { %v1751_v56 = vmul.f32 %v2468_v59, %v3640_v46  ;;  %v1750_v0 = vmul.f32 %v2468_v59, %v3641_v40  ;;  %v3651_v40 = vld [vmem:[#allocation13_spill] sm:$0xff] }
 0x36e   : > { %826 = vperm.xlu1 %2292, %v812_v62   ;;  %v3647_v62 = vld [vmem:[#allocation9_spill] sm:$0xff] }
 0x36f   : > { %v2228_v25 = vpack.c.bf16 %v1751_v56, %v1748_v58  ;;  %v2230_v20 = vpack.c.bf16 %v1750_v0, %v1747_v5 }
 0x371   : > { %2229 = vmatprep.subr.bf16.mxu0 %v2228_v25  ;;  %v1866_v25 = vstv %s1865_s23  ;;  %s2499_s23 = scalar_lea.vmem %s2498_s22, 2048 }
 0x372   : > { %p2501_p1 = scmp.lt.s32.totalorder %s2499_s23, %s2493_s17 }
 0x374   : > { %2231 = vmatpush1.bf16.xpose.msra.mxu0 %v2230_v20  ;;  %v2470_v49 = vpop.eup %2469  ;;  %p2502_p2 = por %p2501_p1, %p2500_p0 }
 0x375   : > { %v1757_v24 = vmul.f32 %v2470_v49, %v3643_v18  ;;  %v1756_v29 = vmul.f32 %v2470_v49, %v3644_v17  ;;  %v2487_v17 = vld [vmem:[%s2684_s24 + $0x10] sm:$0xff] }
 0x376   : > { %p2503_p3 = pnand %p2502_p2, %p2496_p13 }
 0x3a9   : > { %v1658_v10 = vpop.xlane.xlu0 %1657 }
 0x3aa   : > { %2471 = vrcp.f32 %v1658_v10 }
 0x3ad   : > { %v1667_v28 = vpop.xlane.xlu1 %1666 }
 0x3ae   : > { %2473 = vrcp.f32 %v1667_v28 }
 0x3b1   : > { %v1664_v48 = vpop.xlane.xlu0 %1663 }
 0x3b2   : > { %2475 = vrcp.f32 %v1664_v48  ;;  %v2485_v48 = vld [vmem:[%s2684_s24] sm:$0xff] }
 0x3b4   : > { %v2472_v36 = vpop.eup %2471 }
 0x3b5   : > { %v1673_v54 = vpop.xlane.xlu1 %1672  ;;  %v1754_v4 = vmul.f32 %v2472_v36, %v3331_v7  ;;  %v1753_v1 = vmul.f32 %v2472_v36, %v3329_v44  ;;  %v2486_v36 = vld [vmem:[%s2684_s24 + $0x8] sm:$0xff] }
 0x3b6   : > { %2477 = vrcp.f32 %v1673_v54 }
 0x3b7   : > { %v2232_v43 = vpack.c.bf16 %v1757_v24, %v1754_v4  ;;  %v2234_v34 = vpack.c.bf16 %v1756_v29, %v1753_v1 }
 0x3b8   : > { %v2474_v23 = vpop.eup %2473 }
 0x3b9   : > { %v1670_v11 = vpop.xlane.xlu0 %1669  ;;  %2233 = vmatprep.subr.bf16.mxu0 %v2232_v43  ;;  %v1763_v22 = vmul.f32 %v2474_v23, %v3339_v6  ;;  %v1762_v16 = vmul.f32 %v2474_v23, %v3337_v38  ;;  %v3645_v38 = vld [vmem:[#allocation7_spill] sm:$0xff]  ;;  %v822_v9 = vpop.permute.xlu1 %821  ;;  %v2488_v43 = vld [vmem:[%s2684_s24 + $0x18] sm:$0xff] }
 0x3ba   : > { %2479 = vrcp.f32 %v1670_v11  ;;  %2235 = vmatpush1.bf16.xpose.msra.mxu0 %v2234_v34  ;;  %v921_v59 = vadd.f32 %v3647_v62, %v822_v9 }
 0x3bc   : > { %v2476_v31 = vpop.eup %2475 }
 0x3bd   : > { %v1760_v60 = vmul.f32 %v2476_v31, %v3351_v51  ;;  %v1759_v7 = vmul.f32 %v2476_v31, %v3349_v37 }
 0x3bf   : > { %v2236_v44 = vpack.c.bf16 %v1763_v22, %v1760_v60  ;;  %v2238_v27 = vpack.c.bf16 %v1762_v16, %v1759_v7  ;;  %v2489_v22 = vld [vmem:[%s2684_s24 + $0x20] sm:$0xff]  ;;  %v2490_v16 = vld [vmem:[%s2684_s24 + $0x28] sm:$0xff] }
 0x3c0   : > { %v2478_v3 = vpop.eup %2477 }
 0x3c1   : > { %2237 = vmatprep.subr.bf16.mxu0 %v2236_v44  ;;  %v1676_v45 = vpop.xlane.xlu0 %1675  ;;  %v1769_v55 = vmul.f32 %v2478_v3, %v3359_v41  ;;  %v1768_v51 = vmul.f32 %v2478_v3, %v3357_v32 }
 0x3c2   : > { %2239 = vmatpush1.bf16.xpose.msra.mxu0 %v2238_v27  ;;  %2481 = vrcp.f32 %v1676_v45 }
 0x3c4   : > { %v2480_v19 = vpop.eup %2479 }
 0x3c5   : > { %v1766_v8 = vmul.f32 %v2480_v19, %v3369_v2  ;;  %v1765_v52 = vmul.f32 %v2480_v19, %v3367_v42 }
 0x3c7   : > { %v2240_v6 = vpack.c.bf16 %v1769_v55, %v1766_v8  ;;  %v2242_v15 = vpack.c.bf16 %v1768_v51, %v1765_v52  ;;  %v2491_v8 = vld [vmem:[%s2684_s24 + $0x30] sm:$0xff]  ;;  %v2492_v52 = vld [vmem:[%s2684_s24 + $0x38] sm:$0xff] }
 0x3c9   : > { %v817_v37 = vpop.permute.xlu0 %816  ;;  %2241 = vmatprep.subr.bf16.mxu0 %v2240_v6 }
 0x3ca   : > { %v915_v13 = vadd.f32 %v3645_v38, %v817_v37  ;;  %2243 = vmatpush1.bf16.xpose.msra.mxu0 %v2242_v15  ;;  %v913_v14 = vadd.f32 %v3646_v21, %v817_v37 }
 0x3cc   : > { %1840 = vmatprep.mubr.f32.mxu0 %v915_v13  ;;  %v2482_v57 = vpop.eup %2481 }
 0x3cd   : > { %v1772_v41 = vmul.f32 %v2482_v57, %v3379_v53  ;;  %v1771_v32 = vmul.f32 %v2482_v57, %v3377_v39  ;;  %v3648_v53 = vld [vmem:[#allocation8_spill] sm:$0xff]  ;;  %v832_v39 = vpop.permute.xlu0 %831 }
 0x3ce   : > { %v919_v58 = vadd.f32 %v3648_v53, %v822_v9  ;;  %v933_v0 = vadd.f32 %v3651_v40, %v832_v39  ;;  %v931_v5 = vadd.f32 %v3652_v50, %v832_v39 }
 0x3ea   : > { %v1679_v33 = vpop.xlane.xlu1 %1678 }
 0x3eb   : > { %2483 = vrcp.f32 %v1679_v33 }
 0x3ee   : > { %v827_v61 = vpop.permute.xlu1 %826 }
 0x3f5   : > { %v2484_v2 = vpop.eup %2483 }
 0x3f6   : > { %v1775_v42 = vmul.f32 %v2484_v2, %v3418_v35  ;;  %v1774_v30 = vmul.f32 %v2484_v2, %v3416_v12  ;;  %v3649_v35 = vld [vmem:[#allocation11_spill] sm:$0xff]  ;;  %v3650_v12 = vld [vmem:[#allocation10_spill] sm:$0xff] }
 0x3f7   : > { %v927_v46 = vadd.f32 %v3649_v35, %v827_v61  ;;  %v925_v56 = vadd.f32 %v3650_v12, %v827_v61 }
 0x3f8   : > { %v2244_v26 = vpack.c.bf16 %v1775_v42, %v1772_v41  ;;  %v2246_v47 = vpack.c.bf16 %v1774_v30, %v1771_v32 }
 0x3fa   : > { %2245 = vmatprep.subr.bf16.mxu0 %v2244_v26 }
 0x3fb   : > { %2247 = vmatpush1.bf16.xpose.msra.mxu0 %v2246_v47 }
 0x402   : > { %1841 = vmatmul.mubr.f32.vlgmr.msra.gmra.mrb[32].mxu0 %v913_v14 }
 0x403   : > { %1846 = vmatprep.mubr.f32.mxu0 %v921_v59 }
 0x406   : > { %1847 = vmatmul.mubr.f32.gmra.mrb[34].mxu0 %v919_v58 }
 0x407   : > { %1852 = vmatprep.mubr.f32.mxu0 %v927_v46 }
 0x40a   : > { %1853 = vmatmul.mubr.f32.gmra.mrb[36].mxu0 %v925_v56 }
 0x40b   : > { %1858 = vmatprep.mubr.f32.mxu0 %v933_v0 }
 0x40e   : > { %1859 = vmatmul.mubr.f32.gmra.mrb[38].mxu0 %v931_v5 }
 0x4d5   : > { %v1842_v20 = vpop.f32.mrb[32].mxu0 }
 0x4d6   : > { %v1867_v63 = vmul.f32 %v1866_v25, %v1842_v20  ;;  %v1844_v10 = vpop.f32.mrb[33].mxu0 }
 0x4d7   : > { %v1868_v28 = vmul.f32 %v1866_v25, %v1844_v10 }
 0x4d8   : > { %v1875_v49 = vadd.f32 %v2485_v48, %v1867_v63 }
 0x4d9   : > { %v1876_v54 = vadd.f32 %v2486_v36, %v1868_v28  ;;  %v1848_v4 = vpop.f32.mrb[34].mxu0 }
 0x4da   : > { %1883 = vst [vmem:[%s3466_s28] sm:$0xff] %v1875_v49  ;;  %v1869_v18 = vmul.f32 %v1866_v25, %v1848_v4  ;;  %v1850_v24 = vpop.f32.mrb[35].mxu0 }
 0x4db   : > { %1884 = vst [vmem:[%s3466_s28 + $0x8] sm:$0xff] %v1876_v54  ;;  %v1870_v1 = vmul.f32 %v1866_v25, %v1850_v24 }
 0x4dc   : > { %v1877_v29 = vadd.f32 %v2487_v17, %v1869_v18 }
 0x4dd   : > { %v1878_v34 = vadd.f32 %v2488_v43, %v1870_v1  ;;  %v1854_v11 = vpop.f32.mrb[36].mxu0 }
 0x4de   : > { %1885 = vst [vmem:[%s3466_s28 + $0x10] sm:$0xff] %v1877_v29  ;;  %v1871_v23 = vmul.f32 %v1866_v25, %v1854_v11  ;;  %v1856_v31 = vpop.f32.mrb[37].mxu0 }
 0x4df   : > { %1886 = vst [vmem:[%s3466_s28 + $0x18] sm:$0xff] %v1878_v34  ;;  %v1872_v60 = vmul.f32 %v1866_v25, %v1856_v31 }
 0x4e0   : > { %v1879_v7 = vadd.f32 %v2489_v22, %v1871_v23 }
 0x4e1   : > { %v1880_v44 = vadd.f32 %v2490_v16, %v1872_v60  ;;  %v1860_v27 = vpop.f32.mrb[38].mxu0 }
 0x4e2   : > { %1887 = vst [vmem:[%s3466_s28 + $0x20] sm:$0xff] %v1879_v7  ;;  %v1873_v3 = vmul.f32 %v1866_v25, %v1860_v27  ;;  %v1862_v19 = vpop.f32.mrb[39].mxu0 }
 0x4e3   : > { %1888 = vst [vmem:[%s3466_s28 + $0x28] sm:$0xff] %v1880_v44  ;;  %v1874_v45 = vmul.f32 %v1866_v25, %v1862_v19 }
 0x4e4   : > { %v1881_v55 = vadd.f32 %v2491_v8, %v1873_v3 }
 0x4e5   : > { %v1882_v51 = vadd.f32 %v2492_v52, %v1874_v45 }
 0x4e6   : > { %1889 = vst [vmem:[%s3466_s28 + $0x30] sm:$0xff] %v1881_v55 }
 0x4e7   : > { %1890 = vst [vmem:[%s3466_s28 + $0x38] sm:$0xff] %v1882_v51 }
 0x4e8   : > { %2506 = shalt.err (!%p2503_p3)
}
 0x4e9   : > { %s2507_s24 = scalar_lea.hbm %s3484_s15, 1024  ;;  %s2511_s28 = scalar_lea.hbm %s3543_s9, 2048 }
 0x4ea   : > { %p2508_p4 = scmp.ne.s32.totalorder %s3484_s15, %s2507_s24  ;;  %p2512_p9 = scmp.lt.u32.totalorder %s3484_s15, %s3543_s9 }
 0x4eb   : > { %p2513_p10 = scmp.lt.u32.totalorder %s2511_s28, %s2507_s24  ;;  %p2515_p12 = scmp.lt.u32.totalorder %s2507_s24, %s3484_s15 }
 0x4ec   : > { %p2509_p7 = pnand %p2508_p4, %p2653_p5 }
 0x4ed   : > { %p2514_p11 = por %p2513_p10, %p2512_p9 }
 0x4ee   : > { %p2510_p8 = pneg %p2509_p7 }
 0x4ef   : > { %p2516_p13 = por %p2515_p12, %p2514_p11 }
 0x4f1   : > { %p2517_p0 = pnand %p2516_p13, %p2510_p8 }
 0x4f3   : > { %2520 = shalt.err (!%p2517_p0)
}
 0x4f4   : > { %s2560_s10 = smov 256   ;;  %s2561_s17 = smov 16  }
 0x4f5   : > { %2248 = dma.vmem_to_hbm [thread:$0]  (%p2653_p5), %s3486_s29, 1024, %s3484_s15, %s3493_s8, %s2560_s10, %s2560_s10, %s2561_s17  }
 0x4f6 PF: > { %p2254_p1 = scmp.ge.s32.totalorder %s2555_s14, 2  ;;  %s1920_s18 = sand.u32 1, %s2543_s11  }
 0x4f7   : > { %s1921_s22 = scalar_lea.sflag [#allocation4], %s1920_s18 }
 0x4f8   : > { %p2251_p2 = pnand %p2254_p1, %p2657_p6 }
 0x4fa   : > { %2538 = dma.done.wait (!%p2251_p2), %s1921_s22, 1024  }
 0x4fb   : > { %2540 = vsyncadd (!%p2251_p2), %s1921_s22, 4294966272  ;;  %p20_p3 = scmp.ge.s32.totalorder %s2640_s16, 4   ;;  %s3653_s11 = smov %s2547_s12 }
 0x4fc   : > { %s3654_s12 = smov %s2551_s13  ;;  %s3655_s13 = smov %s2651_s19 }
 0x4fd   : > { %s3656_s14 = smov %s2640_s16  ;;  %22 = sbr.rel (!%p20_p3) target bundleno = 5 (0x5), region = 94 }
 0x504   :  { %1926 = vsyncpa [#allocation4], 1 }
 0x505   :  { %1928 = vsyncpa [#allocation4 + $0x1], 1 }

</bundles_post_ra>
